<compile_context>
chip_gen: v7x
topology: tpu7x:2x2x1
jax: 0.10.0
libtpu: 0.0.40
codegen_flags: <defaults>
</compile_context>

<pallas_src>
import functools

import jax
import jax.numpy as jnp
from jax.experimental import pallas as pl
from jax.experimental.pallas import tpu as pltpu


def _full_spec(shape):
    """BlockSpec for a small parameter array that is fully resident each step."""
    zeros = (0,) * len(shape)
    return pl.BlockSpec(shape, lambda b, _z=zeros: _z)


# --------------------------------------------------------------------------- #
# Fused ScConv kernel (SRU + CRU) — one grid step per batch element
# --------------------------------------------------------------------------- #
def _scconv_kernel(x_ref, gamma_ref, beta_ref, wgam_ref, ws1_ref, ws2_ref,
                   wg_ref, bg_ref, wpwc2_ref, mask_ref, o_ref, taps_ref, *,
                   group_num, c_half, up_channel, up_cs, low_cs,
                   gate_threshold, eps, D, H, W, ksz):
    xb = x_ref[0].astype(jnp.float32)                          # (C, S)
    C, S = xb.shape
    cg = C // group_num
    inv_s = 1.0 / S
    n_taps = ksz ** 3
    pad = ksz // 2
    c_top = C - low_cs

    # ---- SRU: GroupNorm stats (lane reduce, then tiny per-group VPU average;
    #           keeps the serial stat chain off the MXU) ----
    ch_mean = jnp.sum(xb, axis=1, keepdims=True) * inv_s       # (C, 1)
    ch_msq = jnp.sum(xb * xb, axis=1, keepdims=True) * inv_s   # (C, 1)

    def group_avg(v):                                          # (C,1) -> (C,1)
        # TODO(synk): for large C/group_num switch to a single
        # (group_num, cg, 1) reshaped reduce (review item); the unrolled form
        # is kept here because it is negligible at small C and known to lower.
        inv_cg = 1.0 / cg
        parts = []
        for g in range(group_num):
            s = jnp.sum(v[g * cg:(g + 1) * cg], axis=0, keepdims=True) * inv_cg
            parts.append(jnp.broadcast_to(s, (cg, 1)))
        return jnp.concatenate(parts, axis=0)

    mu = group_avg(ch_mean)                                    # (C, 1)
    var = group_avg(ch_msq) - mu * mu
    inv_std = jax.lax.rsqrt(var + eps)
    scale = gamma_ref[...] * inv_std                           # (C, 1)
    shift = beta_ref[...] - mu * scale
    gn = xb * scale + shift                                    # (C, S)

    # ---- SRU: sigmoid gate, hard threshold, channel reconstruct ----
    rw = jax.nn.sigmoid(gn * wgam_ref[...])                    # (C, S)
    w1 = jnp.where(rw > gate_threshold, 1.0, rw)
    w2 = jnp.where(rw > gate_threshold, 0.0, rw)
    y_top = w1[:c_half] * xb[:c_half] + w2[c_half:] * xb[c_half:]
    y_bot = w1[c_half:] * xb[c_half:] + w2[:c_half] * xb[:c_half]
    if up_channel == c_half:       # alpha = 0.5: CRU split == reconstruct halves
        up_in, low_in = y_top, y_bot
    else:                          # generic alpha: needs the stitched y
        y = jnp.concatenate([y_top, y_bot], axis=0)
        up_in, low_in = y[:up_channel], y[up_channel:]

    # ---- CRU squeeze convs (channel matmuls, lane-dense N = S) ----
    up_sq = jnp.dot(ws1_ref[...], up_in,
                    preferred_element_type=jnp.float32)        # (up_cs, S)
    low_sq = jnp.dot(ws2_ref[...], low_in,
                     preferred_element_type=jnp.float32)       # (low_cs, S)

    # ---- GWC (+PWC1 folded into the centre tap): stack 27 rolled + pre-masked
    #      taps into VMEM scratch, then ONE (C, 27*up_cs) @ (27*up_cs, S) dot ----
    for t in range(n_taps):
        kd = t // (ksz * ksz) - pad
        kh = (t // ksz) % ksz - pad
        kw = t % ksz - pad
        off = kd * H * W + kh * W + kw
        if off == 0:
            tap = up_sq                                        # centre tap: all valid
        else:
            tap = pltpu.roll(up_sq, (-off) % S, axis=1) * mask_ref[t:t + 1, :]
        taps_ref[t * up_cs:(t + 1) * up_cs, :] = tap
    y1 = jnp.dot(wg_ref[...], taps_ref[...],
                 preferred_element_type=jnp.float32) + bg_ref[...]   # (C, S)

    # ---- PWC2 gives the top half of Y2; the bottom half is low_sq itself ----
    y2_top = jnp.dot(wpwc2_ref[...], low_sq,
                     preferred_element_type=jnp.float32)       # (c_top, S)

    # ---- channel attention: softmax over the 2C pooled means, folded into
    #      out = a1 * Y1 + a2 * Y2 (no 2C slab, no Y2 concat) ----
    p1 = jnp.sum(y1, axis=1, keepdims=True) * inv_s            # (C, 1)
    p2t = jnp.sum(y2_top, axis=1, keepdims=True) * inv_s       # (c_top, 1)
    p2b = jnp.sum(low_sq, axis=1, keepdims=True) * inv_s       # (low_cs, 1)
    m = jnp.maximum(jnp.max(p1, axis=0, keepdims=True),
                    jnp.maximum(jnp.max(p2t, axis=0, keepdims=True),
                                jnp.max(p2b, axis=0, keepdims=True)))  # (1,1)
    e1 = jnp.exp(p1 - m)
    e2t = jnp.exp(p2t - m)
    e2b = jnp.exp(p2b - m)
    inv_den = 1.0 / (jnp.sum(e1, axis=0, keepdims=True)
                     + jnp.sum(e2t, axis=0, keepdims=True)
                     + jnp.sum(e2b, axis=0, keepdims=True))    # (1, 1)
    a1 = e1 * inv_den                                          # (C, 1)
    a2t = e2t * inv_den                                        # (c_top, 1)
    a2b = e2b * inv_den                                        # (low_cs, 1)

    o_ref[0, 0:c_top, :] = (a1[:c_top] * y1[:c_top]
                            + a2t * y2_top).astype(o_ref.dtype)
    o_ref[0, c_top:C, :] = (a1[c_top:] * y1[c_top:]
                            + a2b * low_sq).astype(o_ref.dtype)


# --------------------------------------------------------------------------- #
# Wrapper
# --------------------------------------------------------------------------- #
def scconv_pallas(x, params, *, group_num=4, gate_threshold=0.5, alpha=0.5,
                  squeeze_radio=2, group_size=2, group_kernel_size=3,
                  io_dtype=jnp.float32):
    """x: (B, C, D, H, W) float32 -> (B, C, D, H, W) (ScConv forward).

    io_dtype: HBM carriage dtype of x/out (use jnp.bfloat16 on bandwidth-bound
    v5e/v6e; all in-kernel math stays f32).
    """
    B, C, D, H, W = x.shape
    S = D * H * W
    up_channel = int(alpha * C)
    low_channel = C - up_channel
    up_cs = up_channel // squeeze_radio
    low_cs = low_channel // squeeze_radio
    ksz = group_kernel_size
    n_taps = ksz ** 3

    # Divisibility checks (odd configs would silently mis-shape otherwise).
    assert C % 2 == 0, "op_channel must be even (SRU reconstruct split)"
    assert C % group_num == 0, "op_channel must divide by group_num"
    assert C % group_size == 0, "op_channel must divide by group_size"
    assert up_channel % squeeze_radio == 0 and low_channel % squeeze_radio == 0
    assert up_cs % group_size == 0, "up_channel//squeeze_radio must divide by group_size"

    gamma, beta, ws1, ws2, wgwc, bgwc, wpwc1, wpwc2 = params

    # ---- VMEM budget: double-buffered I/O slabs + in-kernel (C,S) temporaries
    #      + the stacked-tap scratch + the halo-mask table. ----
    est_vmem_bytes = 4 * S * (4 * C                 # 2x-buffered x + out slabs
                              + 6 * C               # gn/rw/w1/w2/y/y1 temporaries
                              + 2 * n_taps          # 2x-buffered halo masks
                              + n_taps * up_cs      # stacked-tap scratch
                              + 2 * (up_cs + low_cs))
    try:
        vmem_cap = int(pltpu.get_tpu_info().vmem_capacity_bytes)
    except Exception:
        vmem_cap = 64 * 1024 * 1024                 # conservative (v7x per-TC)
    vmem_limit = min(int(0.75 * vmem_cap), 100 * 1024 * 1024)
    if est_vmem_bytes > vmem_limit:
        # TODO(synk): S-tiled two-pass variant (GN-stats pass + apply pass with
        # a pad*H*W halo per S tile, second "parallel" axis for v7x megacore)
        # for volumes that do not fit the resident-S path.
        raise NotImplementedError("volume too large for resident-S ScConv path")

    x_flat = x.reshape(B, C, S).astype(io_dtype)

    # ---- parameter prep (tiny, wrapper side) ----
    gamma_2d = gamma.reshape(C, 1).astype(jnp.float32)
    beta_2d = beta.reshape(C, 1).astype(jnp.float32)
    wgam_2d = (gamma / jnp.sum(gamma)).reshape(C, 1).astype(jnp.float32)
    ws1_2d = ws1.reshape(up_cs, up_channel).astype(jnp.float32)
    ws2_2d = ws2.reshape(low_cs, low_channel).astype(jnp.float32)

    # Dense per-tap GWC weights (group structure expanded with zeros), PWC1
    # folded into the centre tap, then stacked to (C, n_taps*up_cs) so the GWC
    # becomes one matmul against the stacked-tap scratch.
    in_pg = up_cs // group_size
    out_pg = C // group_size
    wg_taps = wgwc.reshape(C, in_pg, n_taps).transpose(2, 0, 1)   # (27, C, in_pg)
    wtaps = jnp.zeros((n_taps, C, up_cs), jnp.float32)
    for g in range(group_size):
        wtaps = wtaps.at[:, g * out_pg:(g + 1) * out_pg,
                         g * in_pg:(g + 1) * in_pg].set(
            wg_taps[:, g * out_pg:(g + 1) * out_pg, :])
    wtaps = wtaps.at[n_taps // 2].add(wpwc1.reshape(C, up_cs).astype(jnp.float32))
    wg_stacked = jnp.transpose(wtaps, (1, 0, 2)).reshape(C, n_taps * up_cs)
    bg_2d = bgwc.reshape(C, 1).astype(jnp.float32)
    wpwc2_2d = wpwc2.reshape(C - low_cs, low_cs).astype(jnp.float32)

    # Precomputed halo masks (one f32 row per tap) for the SAME 3x3x3 conv
    # expressed as lane rolls of the flat (d,h,w) layout.
    pad = ksz // 2
    d_idx, h_idx, w_idx = jnp.meshgrid(
        jnp.arange(D, dtype=jnp.int32), jnp.arange(H, dtype=jnp.int32),
        jnp.arange(W, dtype=jnp.int32), indexing="ij")
    d_f = d_idx.reshape(S)
    h_f = h_idx.reshape(S)
    w_f = w_idx.reshape(S)
    mask_rows = []
    for t in range(n_taps):
        kd = t // (ksz * ksz) - pad
        kh = (t // ksz) % ksz - pad
        kw = t % ksz - pad
        valid = ((d_f + kd >= 0) & (d_f + kd < D) &
                 (h_f + kh >= 0) & (h_f + kh < H) &
                 (w_f + kw >= 0) & (w_f + kw < W))
        mask_rows.append(valid)
    masks = jnp.stack(mask_rows, axis=0).astype(jnp.float32)       # (27, S)

    out_flat = pl.pallas_call(
        functools.partial(
            _scconv_kernel, group_num=group_num, c_half=C // 2,
            up_channel=up_channel, up_cs=up_cs, low_cs=low_cs,
            gate_threshold=gate_threshold, eps=1e-5, D=D, H=H, W=W, ksz=ksz),
        out_shape=jax.ShapeDtypeStruct((B, C, S), io_dtype),
        grid_spec=pltpu.PrefetchScalarGridSpec(
            num_scalar_prefetch=0,
            grid=(B,),
            in_specs=[
                pl.BlockSpec((1, C, S), lambda b: (b, 0, 0)),   # x
                _full_spec((C, 1)),                             # gamma
                _full_spec((C, 1)),                             # beta
                _full_spec((C, 1)),                             # gamma / sum(gamma)
                _full_spec((up_cs, up_channel)),                # squeeze1
                _full_spec((low_cs, low_channel)),              # squeeze2
                _full_spec((C, n_taps * up_cs)),                # stacked GWC (+PWC1)
                _full_spec((C, 1)),                             # GWC bias
                _full_spec((C - low_cs, low_cs)),               # PWC2
                _full_spec((n_taps, S)),                        # halo masks
            ],
            out_specs=pl.BlockSpec((1, C, S), lambda b: (b, 0, 0)),
            scratch_shapes=[pltpu.VMEM((n_taps * up_cs, S), jnp.float32)],
        ),
        compiler_params=pltpu.CompilerParams(
            dimension_semantics=("parallel",),        # batch steps are independent
            vmem_limit_bytes=vmem_limit),
    )(x_flat, gamma_2d, beta_2d, wgam_2d, ws1_2d, ws2_2d, wg_stacked, bg_2d,
      wpwc2_2d, masks)

    return out_flat.reshape(B, C, D, H, W).astype(x.dtype)


# --------------------------------------------------------------------------- #
# Pure-JAX reference (mirrors the PyTorch ScConv forward); matmuls/conv run at
# HIGHEST precision explicitly — no global precision side effect.
# --------------------------------------------------------------------------- #
def _reference(x, params, *, group_num=4, gate_threshold=0.5, alpha=0.5,
               squeeze_radio=2, group_size=2, group_kernel_size=3):
    P = jax.lax.Precision.HIGHEST
    gamma, beta, ws1, ws2, wgwc, bgwc, wpwc1, wpwc2 = params
    B, C, D, H, W = x.shape
    eps = 1e-5
    # --- SRU ---
    xg = x.reshape(B, group_num, C // group_num, D, H, W)
    mean = xg.mean(axis=(2, 3, 4, 5), keepdims=True)
    var = xg.var(axis=(2, 3, 4, 5), keepdims=True)
    gn = ((xg - mean) / jnp.sqrt(var + eps)).reshape(B, C, D, H, W)
    gn = gn * gamma[None, :, None, None, None] + beta[None, :, None, None, None]
    w_gamma = (gamma / jnp.sum(gamma))[None, :, None, None, None]
    rw = jax.nn.sigmoid(gn * w_gamma)
    w1 = jnp.where(rw > gate_threshold, 1.0, rw)
    w2 = jnp.where(rw > gate_threshold, 0.0, rw)
    x1 = w1 * x
    x2 = w2 * x
    c2 = C // 2
    y = jnp.concatenate([x1[:, :c2] + x2[:, c2:], x1[:, c2:] + x2[:, :c2]], axis=1)
    # --- CRU ---
    up_channel = int(alpha * C)
    up, low = y[:, :up_channel], y[:, up_channel:]
    up = jnp.einsum("oc,bcdhw->bodhw", ws1, up, precision=P)
    low = jnp.einsum("oc,bcdhw->bodhw", ws2, low, precision=P)
    pad = group_kernel_size // 2
    gwc = jax.lax.conv_general_dilated(
        up, wgwc, window_strides=(1, 1, 1), padding=[(pad, pad)] * 3,
        dimension_numbers=("NCDHW", "OIDHW", "NCDHW"),
        feature_group_count=group_size,
        precision=P) + bgwc[None, :, None, None, None]
    y1 = gwc + jnp.einsum("oc,bcdhw->bodhw", wpwc1, up, precision=P)
    y2 = jnp.concatenate(
        [jnp.einsum("oc,bcdhw->bodhw", wpwc2, low, precision=P), low], axis=1)
    out = jnp.concatenate([y1, y2], axis=1)
    attn = jax.nn.softmax(out.mean(axis=(2, 3, 4), keepdims=True), axis=1)
    out = attn * out
    return out[:, :C] + out[:, C:]


def make_params(key, C, *, alpha=0.5, squeeze_radio=2, group_size=2,
                group_kernel_size=3):
    up_channel = int(alpha * C)
    low_channel = C - up_channel
    up_cs = up_channel // squeeze_radio
    low_cs = low_channel // squeeze_radio
    ks = jax.random.split(key, 8)
    gamma = jax.random.uniform(ks[0], (C,), jnp.float32, 0.5, 1.5)   # GN weight
    beta = jax.random.normal(ks[1], (C,), jnp.float32) * 0.02        # GN bias
    ws1 = jax.random.normal(ks[2], (up_cs, up_channel), jnp.float32) * 0.4
    ws2 = jax.random.normal(ks[3], (low_cs, low_channel), jnp.float32) * 0.4
    wgwc = jax.random.normal(
        ks[4], (C, up_cs // group_size, group_kernel_size, group_kernel_size,
                group_kernel_size), jnp.float32) * 0.2
    bgwc = jax.random.normal(ks[5], (C,), jnp.float32) * 0.1
    wpwc1 = jax.random.normal(ks[6], (C, up_cs), jnp.float32) * 0.4
    wpwc2 = jax.random.normal(ks[7], (C - low_cs, low_cs), jnp.float32) * 0.4
    return (gamma, beta, ws1, ws2, wgwc, bgwc, wpwc1, wpwc2)


if __name__ == "__main__":
    key = jax.random.PRNGKey(0)
    k_sign, k_mag, k_par = jax.random.split(key, 3)

    B, C, D, H, W = 2, 8, 8, 8, 8   # S = 512 lanes, C = 8 sublanes

    # Input magnitudes are kept away from zero so the SRU hard gate
    # (reweights > 0.5  <=>  GroupNorm output > 0) is decided identically by the
    # kernel and the reference despite last-bit float differences.
    sign = jnp.where(jax.random.bernoulli(k_sign, 0.5, (B, C, D, H, W)), 1.0, -1.0)
    mag = jax.random.uniform(k_mag, (B, C, D, H, W), jnp.float32, 1.0, 2.0)
    x = (sign * mag).astype(jnp.float32)

    params = make_params(k_par, C)

    fn = jax.jit(scconv_pallas)
    out = jax.block_until_ready(fn(x, params))

    ref = _reference(x, params)
    assert out.shape == (B, C, D, H, W)
    max_err = float(jnp.max(jnp.abs(out - ref)))
    # Kernel matmuls run at the MXU's default (bf16-operand) precision per the
    # perf review, while the reference runs at HIGHEST precision, so allow
    # bf16-level differences here.
    assert max_err < 5e-2, f"mismatch vs reference: max abs err = {max_err}"
    print("KERNEL_OK")
</pallas_src>

<mosaic_0001>
module attributes {stable_mosaic.version = 11 : i64} {
  func.func @_scconv_kernel(%arg0: i32, %arg1: memref<1x8x512xf32, #tpu.memory_space<vmem>>, %arg2: memref<8x1xf32, #tpu.memory_space<vmem>>, %arg3: memref<8x1xf32, #tpu.memory_space<vmem>>, %arg4: memref<8x1xf32, #tpu.memory_space<vmem>>, %arg5: memref<2x4xf32, #tpu.memory_space<vmem>>, %arg6: memref<2x4xf32, #tpu.memory_space<vmem>>, %arg7: memref<8x54xf32, #tpu.memory_space<vmem>>, %arg8: memref<8x1xf32, #tpu.memory_space<vmem>>, %arg9: memref<6x2xf32, #tpu.memory_space<vmem>>, %arg10: memref<27x512xf32, #tpu.memory_space<vmem>>, %arg11: memref<1x8x512xf32, #tpu.memory_space<vmem>>, %arg12: memref<54x512xf32, #tpu.memory_space<vmem>>) attributes {dimension_semantics = [#tpu.dimension_semantics<parallel>], iteration_bounds = array<i64: 2>, scalar_prefetch = 0 : i64, scratch_operands = 1 : i64, tpu.core_type = #tpu.core_type<tc>, window_params = [{transform_indices = @transform_0, window_bounds = array<i64: 1, 8, 512>}, {pipeline_mode = #tpu.pipeline_mode<synchronous>, transform_indices = @transform_1, window_bounds = array<i64: 8, 1>}, {pipeline_mode = #tpu.pipeline_mode<synchronous>, transform_indices = @transform_2, window_bounds = array<i64: 8, 1>}, {pipeline_mode = #tpu.pipeline_mode<synchronous>, transform_indices = @transform_3, window_bounds = array<i64: 8, 1>}, {pipeline_mode = #tpu.pipeline_mode<synchronous>, transform_indices = @transform_4, window_bounds = array<i64: 2, 4>}, {pipeline_mode = #tpu.pipeline_mode<synchronous>, transform_indices = @transform_5, window_bounds = array<i64: 2, 4>}, {pipeline_mode = #tpu.pipeline_mode<synchronous>, transform_indices = @transform_6, window_bounds = array<i64: 8, 54>}, {pipeline_mode = #tpu.pipeline_mode<synchronous>, transform_indices = @transform_7, window_bounds = array<i64: 8, 1>}, {pipeline_mode = #tpu.pipeline_mode<synchronous>, transform_indices = @transform_8, window_bounds = array<i64: 6, 2>}, {pipeline_mode = #tpu.pipeline_mode<synchronous>, transform_indices = @transform_9, window_bounds = array<i64: 27, 512>}, {transform_indices = @transform_10, window_bounds = array<i64: 1, 8, 512>}]} {
    %c0 = arith.constant 0 : index
    %c0_0 = arith.constant 0 : index
    %c0_1 = arith.constant 0 : index
    %0 = vector.load %arg1[%c0, %c0_0, %c0_1] : memref<1x8x512xf32, #tpu.memory_space<vmem>>, vector<1x8x512xf32>
    %1 = vector.shape_cast %0 : vector<1x8x512xf32> to vector<8x512xf32>
    %cst = arith.constant dense<0.000000e+00> : vector<8xf32>
    %2 = vector.multi_reduction <add>, %1, %cst [1] : vector<8x512xf32> to vector<8xf32>
    %3 = vector.shape_cast %2 : vector<8xf32> to vector<8x1xf32>
    %cst_2 = arith.constant 0.001953125 : f32
    %4 = vector.broadcast %cst_2 : f32 to vector<8x1xf32>
    %5 = arith.mulf %3, %4 : vector<8x1xf32>
    %6 = arith.mulf %1, %1 : vector<8x512xf32>
    %cst_3 = arith.constant dense<0.000000e+00> : vector<8xf32>
    %7 = vector.multi_reduction <add>, %6, %cst_3 [1] : vector<8x512xf32> to vector<8xf32>
    %8 = vector.shape_cast %7 : vector<8xf32> to vector<8x1xf32>
    %cst_4 = arith.constant 0.001953125 : f32
    %9 = vector.broadcast %cst_4 : f32 to vector<8x1xf32>
    %10 = arith.mulf %8, %9 : vector<8x1xf32>
    %11 = vector.extract_strided_slice %5 {offsets = [0, 0], sizes = [2, 1], strides = [1, 1]} : vector<8x1xf32> to vector<2x1xf32>
    %cst_5 = arith.constant dense<0.000000e+00> : vector<1xf32>
    %12 = vector.multi_reduction <add>, %11, %cst_5 [0] : vector<2x1xf32> to vector<1xf32>
    %13 = vector.shape_cast %12 : vector<1xf32> to vector<1x1xf32>
    %cst_6 = arith.constant 5.000000e-01 : f32
    %14 = vector.broadcast %cst_6 : f32 to vector<1x1xf32>
    %15 = arith.mulf %13, %14 : vector<1x1xf32>
    %16 = vector.shape_cast %15 : vector<1x1xf32> to vector<1x1xf32>
    %17 = vector.broadcast %16 : vector<1x1xf32> to vector<2x1xf32>
    %18 = vector.extract_strided_slice %5 {offsets = [2, 0], sizes = [2, 1], strides = [1, 1]} : vector<8x1xf32> to vector<2x1xf32>
    %cst_7 = arith.constant dense<0.000000e+00> : vector<1xf32>
    %19 = vector.multi_reduction <add>, %18, %cst_7 [0] : vector<2x1xf32> to vector<1xf32>
    %20 = vector.shape_cast %19 : vector<1xf32> to vector<1x1xf32>
    %cst_8 = arith.constant 5.000000e-01 : f32
    %21 = vector.broadcast %cst_8 : f32 to vector<1x1xf32>
    %22 = arith.mulf %20, %21 : vector<1x1xf32>
    %23 = vector.shape_cast %22 : vector<1x1xf32> to vector<1x1xf32>
    %24 = vector.broadcast %23 : vector<1x1xf32> to vector<2x1xf32>
    %25 = vector.extract_strided_slice %5 {offsets = [4, 0], sizes = [2, 1], strides = [1, 1]} : vector<8x1xf32> to vector<2x1xf32>
    %cst_9 = arith.constant dense<0.000000e+00> : vector<1xf32>
    %26 = vector.multi_reduction <add>, %25, %cst_9 [0] : vector<2x1xf32> to vector<1xf32>
    %27 = vector.shape_cast %26 : vector<1xf32> to vector<1x1xf32>
    %cst_10 = arith.constant 5.000000e-01 : f32
    %28 = vector.broadcast %cst_10 : f32 to vector<1x1xf32>
    %29 = arith.mulf %27, %28 : vector<1x1xf32>
    %30 = vector.shape_cast %29 : vector<1x1xf32> to vector<1x1xf32>
    %31 = vector.broadcast %30 : vector<1x1xf32> to vector<2x1xf32>
    %32 = vector.extract_strided_slice %5 {offsets = [6, 0], sizes = [2, 1], strides = [1, 1]} : vector<8x1xf32> to vector<2x1xf32>
    %cst_11 = arith.constant dense<0.000000e+00> : vector<1xf32>
    %33 = vector.multi_reduction <add>, %32, %cst_11 [0] : vector<2x1xf32> to vector<1xf32>
    %34 = vector.shape_cast %33 : vector<1xf32> to vector<1x1xf32>
    %cst_12 = arith.constant 5.000000e-01 : f32
    %35 = vector.broadcast %cst_12 : f32 to vector<1x1xf32>
    %36 = arith.mulf %34, %35 : vector<1x1xf32>
    %37 = vector.shape_cast %36 : vector<1x1xf32> to vector<1x1xf32>
    %38 = vector.broadcast %37 : vector<1x1xf32> to vector<2x1xf32>
    %39 = tpu.concatenate %17, %24, %31, %38 in 0 : vector<2x1xf32>, vector<2x1xf32>, vector<2x1xf32>, vector<2x1xf32> -> vector<8x1xf32>
    %40 = vector.extract_strided_slice %10 {offsets = [0, 0], sizes = [2, 1], strides = [1, 1]} : vector<8x1xf32> to vector<2x1xf32>
    %cst_13 = arith.constant dense<0.000000e+00> : vector<1xf32>
    %41 = vector.multi_reduction <add>, %40, %cst_13 [0] : vector<2x1xf32> to vector<1xf32>
    %42 = vector.shape_cast %41 : vector<1xf32> to vector<1x1xf32>
    %cst_14 = arith.constant 5.000000e-01 : f32
    %43 = vector.broadcast %cst_14 : f32 to vector<1x1xf32>
    %44 = arith.mulf %42, %43 : vector<1x1xf32>
    %45 = vector.shape_cast %44 : vector<1x1xf32> to vector<1x1xf32>
    %46 = vector.broadcast %45 : vector<1x1xf32> to vector<2x1xf32>
    %47 = vector.extract_strided_slice %10 {offsets = [2, 0], sizes = [2, 1], strides = [1, 1]} : vector<8x1xf32> to vector<2x1xf32>
    %cst_15 = arith.constant dense<0.000000e+00> : vector<1xf32>
    %48 = vector.multi_reduction <add>, %47, %cst_15 [0] : vector<2x1xf32> to vector<1xf32>
    %49 = vector.shape_cast %48 : vector<1xf32> to vector<1x1xf32>
    %cst_16 = arith.constant 5.000000e-01 : f32
    %50 = vector.broadcast %cst_16 : f32 to vector<1x1xf32>
    %51 = arith.mulf %49, %50 : vector<1x1xf32>
    %52 = vector.shape_cast %51 : vector<1x1xf32> to vector<1x1xf32>
    %53 = vector.broadcast %52 : vector<1x1xf32> to vector<2x1xf32>
    %54 = vector.extract_strided_slice %10 {offsets = [4, 0], sizes = [2, 1], strides = [1, 1]} : vector<8x1xf32> to vector<2x1xf32>
    %cst_17 = arith.constant dense<0.000000e+00> : vector<1xf32>
    %55 = vector.multi_reduction <add>, %54, %cst_17 [0] : vector<2x1xf32> to vector<1xf32>
    %56 = vector.shape_cast %55 : vector<1xf32> to vector<1x1xf32>
    %cst_18 = arith.constant 5.000000e-01 : f32
    %57 = vector.broadcast %cst_18 : f32 to vector<1x1xf32>
    %58 = arith.mulf %56, %57 : vector<1x1xf32>
    %59 = vector.shape_cast %58 : vector<1x1xf32> to vector<1x1xf32>
    %60 = vector.broadcast %59 : vector<1x1xf32> to vector<2x1xf32>
    %61 = vector.extract_strided_slice %10 {offsets = [6, 0], sizes = [2, 1], strides = [1, 1]} : vector<8x1xf32> to vector<2x1xf32>
    %cst_19 = arith.constant dense<0.000000e+00> : vector<1xf32>
    %62 = vector.multi_reduction <add>, %61, %cst_19 [0] : vector<2x1xf32> to vector<1xf32>
    %63 = vector.shape_cast %62 : vector<1xf32> to vector<1x1xf32>
    %cst_20 = arith.constant 5.000000e-01 : f32
    %64 = vector.broadcast %cst_20 : f32 to vector<1x1xf32>
    %65 = arith.mulf %63, %64 : vector<1x1xf32>
    %66 = vector.shape_cast %65 : vector<1x1xf32> to vector<1x1xf32>
    %67 = vector.broadcast %66 : vector<1x1xf32> to vector<2x1xf32>
    %68 = tpu.concatenate %46, %53, %60, %67 in 0 : vector<2x1xf32>, vector<2x1xf32>, vector<2x1xf32>, vector<2x1xf32> -> vector<8x1xf32>
    %69 = arith.mulf %39, %39 : vector<8x1xf32>
    %70 = arith.subf %68, %69 : vector<8x1xf32>
    %cst_21 = arith.constant 9.99999974E-6 : f32
    %71 = vector.broadcast %cst_21 : f32 to vector<8x1xf32>
    %72 = arith.addf %70, %71 : vector<8x1xf32>
    %73 = math.rsqrt %72 : vector<8x1xf32>
    %c0_22 = arith.constant 0 : index
    %c0_23 = arith.constant 0 : index
    %74 = vector.load %arg2[%c0_22, %c0_23] : memref<8x1xf32, #tpu.memory_space<vmem>>, vector<8x1xf32>
    %75 = arith.mulf %74, %73 : vector<8x1xf32>
    %c0_24 = arith.constant 0 : index
    %c0_25 = arith.constant 0 : index
    %76 = vector.load %arg3[%c0_24, %c0_25] : memref<8x1xf32, #tpu.memory_space<vmem>>, vector<8x1xf32>
    %77 = arith.mulf %39, %75 : vector<8x1xf32>
    %78 = arith.subf %76, %77 : vector<8x1xf32>
    %79 = vector.broadcast %75 : vector<8x1xf32> to vector<8x512xf32>
    %80 = arith.mulf %1, %79 : vector<8x512xf32>
    %81 = vector.broadcast %78 : vector<8x1xf32> to vector<8x512xf32>
    %82 = arith.addf %80, %81 : vector<8x512xf32>
    %c0_26 = arith.constant 0 : index
    %c0_27 = arith.constant 0 : index
    %83 = vector.load %arg4[%c0_26, %c0_27] : memref<8x1xf32, #tpu.memory_space<vmem>>, vector<8x1xf32>
    %84 = vector.broadcast %83 : vector<8x1xf32> to vector<8x512xf32>
    %85 = arith.mulf %82, %84 : vector<8x512xf32>
    %86 = arith.negf %85 : vector<8x512xf32>
    %87 = math.exp %86 : vector<8x512xf32>
    %cst_28 = arith.constant 1.000000e+00 : f32
    %88 = vector.broadcast %cst_28 : f32 to vector<8x512xf32>
    %89 = arith.addf %88, %87 : vector<8x512xf32>
    %90 = arith.divf %88, %89 : vector<8x512xf32>
    %cst_29 = arith.constant 5.000000e-01 : f32
    %91 = vector.broadcast %cst_29 : f32 to vector<8x512xf32>
    %92 = arith.cmpf ogt, %90, %91 : vector<8x512xf32>
    %cst_30 = arith.constant 1.000000e+00 : f32
    %93 = vector.broadcast %cst_30 : f32 to vector<8x512xf32>
    %94 = arith.select %92, %93, %90 : vector<8x512xi1>, vector<8x512xf32>
    %cst_31 = arith.constant 5.000000e-01 : f32
    %95 = vector.broadcast %cst_31 : f32 to vector<8x512xf32>
    %96 = arith.cmpf ogt, %90, %95 : vector<8x512xf32>
    %cst_32 = arith.constant 0.000000e+00 : f32
    %97 = vector.broadcast %cst_32 : f32 to vector<8x512xf32>
    %98 = arith.select %96, %97, %90 : vector<8x512xi1>, vector<8x512xf32>
    %99 = vector.extract_strided_slice %94 {offsets = [0, 0], sizes = [4, 512], strides = [1, 1]} : vector<8x512xf32> to vector<4x512xf32>
    %100 = vector.extract_strided_slice %1 {offsets = [0, 0], sizes = [4, 512], strides = [1, 1]} : vector<8x512xf32> to vector<4x512xf32>
    %101 = arith.mulf %99, %100 : vector<4x512xf32>
    %102 = vector.extract_strided_slice %98 {offsets = [4, 0], sizes = [4, 512], strides = [1, 1]} : vector<8x512xf32> to vector<4x512xf32>
    %103 = vector.extract_strided_slice %1 {offsets = [4, 0], sizes = [4, 512], strides = [1, 1]} : vector<8x512xf32> to vector<4x512xf32>
    %104 = arith.mulf %102, %103 : vector<4x512xf32>
    %105 = arith.addf %101, %104 : vector<4x512xf32>
    %106 = vector.extract_strided_slice %94 {offsets = [4, 0], sizes = [4, 512], strides = [1, 1]} : vector<8x512xf32> to vector<4x512xf32>
    %107 = vector.extract_strided_slice %1 {offsets = [4, 0], sizes = [4, 512], strides = [1, 1]} : vector<8x512xf32> to vector<4x512xf32>
    %108 = arith.mulf %106, %107 : vector<4x512xf32>
    %109 = vector.extract_strided_slice %98 {offsets = [0, 0], sizes = [4, 512], strides = [1, 1]} : vector<8x512xf32> to vector<4x512xf32>
    %110 = vector.extract_strided_slice %1 {offsets = [0, 0], sizes = [4, 512], strides = [1, 1]} : vector<8x512xf32> to vector<4x512xf32>
    %111 = arith.mulf %109, %110 : vector<4x512xf32>
    %112 = arith.addf %108, %111 : vector<4x512xf32>
    %c0_33 = arith.constant 0 : index
    %c0_34 = arith.constant 0 : index
    %113 = vector.load %arg5[%c0_33, %c0_34] : memref<2x4xf32, #tpu.memory_space<vmem>>, vector<2x4xf32>
    %cst_35 = arith.constant dense<0.000000e+00> : vector<2x512xf32>
    %114 = tpu.matmul %113, %105, %cst_35 {dimension_numbers = #tpu.dot_dimension_numbers<[1], [0], [0], [1], [0, 0, 1, 1], [], []>} : vector<2x4xf32>, vector<4x512xf32>, vector<2x512xf32> -> vector<2x512xf32>
    %c0_36 = arith.constant 0 : index
    %c0_37 = arith.constant 0 : index
    %115 = vector.load %arg6[%c0_36, %c0_37] : memref<2x4xf32, #tpu.memory_space<vmem>>, vector<2x4xf32>
    %cst_38 = arith.constant dense<0.000000e+00> : vector<2x512xf32>
    %116 = tpu.matmul %115, %112, %cst_38 {dimension_numbers = #tpu.dot_dimension_numbers<[1], [0], [0], [1], [0, 0, 1, 1], [], []>} : vector<2x4xf32>, vector<4x512xf32>, vector<2x512xf32> -> vector<2x512xf32>
    %c73_i32 = arith.constant 73 : i32
    %117 = tpu.dynamic_rotate %114 by %c73_i32 dim 1 : vector<2x512xf32>, i32 -> vector<2x512xf32>
    %c0_39 = arith.constant 0 : index
    %c0_40 = arith.constant 0 : index
    %118 = vector.load %arg10[%c0_39, %c0_40] : memref<27x512xf32, #tpu.memory_space<vmem>>, vector<1x512xf32>
    %119 = vector.broadcast %118 : vector<1x512xf32> to vector<2x512xf32>
    %120 = arith.mulf %117, %119 : vector<2x512xf32>
    %c0_41 = arith.constant 0 : index
    %c0_42 = arith.constant 0 : index
    %121 = vector.load %arg12[%c0_41, %c0_42] : memref<54x512xf32, #tpu.memory_space<vmem>>, vector<2x512xf32>
    tpu.vector_store %arg12[%c0_41, %c0_42], %120 {strides = array<i32>} : memref<54x512xf32, #tpu.memory_space<vmem>>, vector<2x512xf32>,
    %c72_i32 = arith.constant 72 : i32
    %122 = tpu.dynamic_rotate %114 by %c72_i32 dim 1 : vector<2x512xf32>, i32 -> vector<2x512xf32>
    %c1 = arith.constant 1 : index
    %c0_43 = arith.constant 0 : index
    %123 = vector.load %arg10[%c1, %c0_43] : memref<27x512xf32, #tpu.memory_space<vmem>>, vector<1x512xf32>
    %124 = vector.broadcast %123 : vector<1x512xf32> to vector<2x512xf32>
    %125 = arith.mulf %122, %124 : vector<2x512xf32>
    %c2 = arith.constant 2 : index
    %c0_44 = arith.constant 0 : index
    %126 = vector.load %arg12[%c2, %c0_44] : memref<54x512xf32, #tpu.memory_space<vmem>>, vector<2x512xf32>
    tpu.vector_store %arg12[%c2, %c0_44], %125 {strides = array<i32>} : memref<54x512xf32, #tpu.memory_space<vmem>>, vector<2x512xf32>,
    %c71_i32 = arith.constant 71 : i32
    %127 = tpu.dynamic_rotate %114 by %c71_i32 dim 1 : vector<2x512xf32>, i32 -> vector<2x512xf32>
    %c2_45 = arith.constant 2 : index
    %c0_46 = arith.constant 0 : index
    %128 = vector.load %arg10[%c2_45, %c0_46] : memref<27x512xf32, #tpu.memory_space<vmem>>, vector<1x512xf32>
    %129 = vector.broadcast %128 : vector<1x512xf32> to vector<2x512xf32>
    %130 = arith.mulf %127, %129 : vector<2x512xf32>
    %c4 = arith.constant 4 : index
    %c0_47 = arith.constant 0 : index
    %131 = vector.load %arg12[%c4, %c0_47] : memref<54x512xf32, #tpu.memory_space<vmem>>, vector<2x512xf32>
    tpu.vector_store %arg12[%c4, %c0_47], %130 {strides = array<i32>} : memref<54x512xf32, #tpu.memory_space<vmem>>, vector<2x512xf32>,
    %c65_i32 = arith.constant 65 : i32
    %132 = tpu.dynamic_rotate %114 by %c65_i32 dim 1 : vector<2x512xf32>, i32 -> vector<2x512xf32>
    %c3 = arith.constant 3 : index
    %c0_48 = arith.constant 0 : index
    %133 = vector.load %arg10[%c3, %c0_48] : memref<27x512xf32, #tpu.memory_space<vmem>>, vector<1x512xf32>
    %134 = vector.broadcast %133 : vector<1x512xf32> to vector<2x512xf32>
    %135 = arith.mulf %132, %134 : vector<2x512xf32>
    %c6 = arith.constant 6 : index
    %c0_49 = arith.constant 0 : index
    %136 = vector.load %arg12[%c6, %c0_49] : memref<54x512xf32, #tpu.memory_space<vmem>>, vector<2x512xf32>
    tpu.vector_store %arg12[%c6, %c0_49], %135 {strides = array<i32>} : memref<54x512xf32, #tpu.memory_space<vmem>>, vector<2x512xf32>,
    %c64_i32 = arith.constant 64 : i32
    %137 = tpu.dynamic_rotate %114 by %c64_i32 dim 1 : vector<2x512xf32>, i32 -> vector<2x512xf32>
    %c4_50 = arith.constant 4 : index
    %c0_51 = arith.constant 0 : index
    %138 = vector.load %arg10[%c4_50, %c0_51] : memref<27x512xf32, #tpu.memory_space<vmem>>, vector<1x512xf32>
    %139 = vector.broadcast %138 : vector<1x512xf32> to vector<2x512xf32>
    %140 = arith.mulf %137, %139 : vector<2x512xf32>
    %c8 = arith.constant 8 : index
    %c0_52 = arith.constant 0 : index
    %141 = vector.load %arg12[%c8, %c0_52] : memref<54x512xf32, #tpu.memory_space<vmem>>, vector<2x512xf32>
    tpu.vector_store %arg12[%c8, %c0_52], %140 {strides = array<i32>} : memref<54x512xf32, #tpu.memory_space<vmem>>, vector<2x512xf32>,
    %c63_i32 = arith.constant 63 : i32
    %142 = tpu.dynamic_rotate %114 by %c63_i32 dim 1 : vector<2x512xf32>, i32 -> vector<2x512xf32>
    %c5 = arith.constant 5 : index
    %c0_53 = arith.constant 0 : index
    %143 = vector.load %arg10[%c5, %c0_53] : memref<27x512xf32, #tpu.memory_space<vmem>>, vector<1x512xf32>
    %144 = vector.broadcast %143 : vector<1x512xf32> to vector<2x512xf32>
    %145 = arith.mulf %142, %144 : vector<2x512xf32>
    %c10 = arith.constant 10 : index
    %c0_54 = arith.constant 0 : index
    %146 = vector.load %arg12[%c10, %c0_54] : memref<54x512xf32, #tpu.memory_space<vmem>>, vector<2x512xf32>
    tpu.vector_store %arg12[%c10, %c0_54], %145 {strides = array<i32>} : memref<54x512xf32, #tpu.memory_space<vmem>>, vector<2x512xf32>,
    %c57_i32 = arith.constant 57 : i32
    %147 = tpu.dynamic_rotate %114 by %c57_i32 dim 1 : vector<2x512xf32>, i32 -> vector<2x512xf32>
    %c6_55 = arith.constant 6 : index
    %c0_56 = arith.constant 0 : index
    %148 = vector.load %arg10[%c6_55, %c0_56] : memref<27x512xf32, #tpu.memory_space<vmem>>, vector<1x512xf32>
    %149 = vector.broadcast %148 : vector<1x512xf32> to vector<2x512xf32>
    %150 = arith.mulf %147, %149 : vector<2x512xf32>
    %c12 = arith.constant 12 : index
    %c0_57 = arith.constant 0 : index
    %151 = vector.load %arg12[%c12, %c0_57] : memref<54x512xf32, #tpu.memory_space<vmem>>, vector<2x512xf32>
    tpu.vector_store %arg12[%c12, %c0_57], %150 {strides = array<i32>} : memref<54x512xf32, #tpu.memory_space<vmem>>, vector<2x512xf32>,
    %c56_i32 = arith.constant 56 : i32
    %152 = tpu.dynamic_rotate %114 by %c56_i32 dim 1 : vector<2x512xf32>, i32 -> vector<2x512xf32>
    %c7 = arith.constant 7 : index
    %c0_58 = arith.constant 0 : index
    %153 = vector.load %arg10[%c7, %c0_58] : memref<27x512xf32, #tpu.memory_space<vmem>>, vector<1x512xf32>
    %154 = vector.broadcast %153 : vector<1x512xf32> to vector<2x512xf32>
    %155 = arith.mulf %152, %154 : vector<2x512xf32>
    %c14 = arith.constant 14 : index
    %c0_59 = arith.constant 0 : index
    %156 = vector.load %arg12[%c14, %c0_59] : memref<54x512xf32, #tpu.memory_space<vmem>>, vector<2x512xf32>
    tpu.vector_store %arg12[%c14, %c0_59], %155 {strides = array<i32>} : memref<54x512xf32, #tpu.memory_space<vmem>>, vector<2x512xf32>,
    %c55_i32 = arith.constant 55 : i32
    %157 = tpu.dynamic_rotate %114 by %c55_i32 dim 1 : vector<2x512xf32>, i32 -> vector<2x512xf32>
    %c8_60 = arith.constant 8 : index
    %c0_61 = arith.constant 0 : index
    %158 = vector.load %arg10[%c8_60, %c0_61] : memref<27x512xf32, #tpu.memory_space<vmem>>, vector<1x512xf32>
    %159 = vector.broadcast %158 : vector<1x512xf32> to vector<2x512xf32>
    %160 = arith.mulf %157, %159 : vector<2x512xf32>
    %c16 = arith.constant 16 : index
    %c0_62 = arith.constant 0 : index
    %161 = vector.load %arg12[%c16, %c0_62] : memref<54x512xf32, #tpu.memory_space<vmem>>, vector<2x512xf32>
    tpu.vector_store %arg12[%c16, %c0_62], %160 {strides = array<i32>} : memref<54x512xf32, #tpu.memory_space<vmem>>, vector<2x512xf32>,
    %c9_i32 = arith.constant 9 : i32
    %162 = tpu.dynamic_rotate %114 by %c9_i32 dim 1 : vector<2x512xf32>, i32 -> vector<2x512xf32>
    %c9 = arith.constant 9 : index
    %c0_63 = arith.constant 0 : index
    %163 = vector.load %arg10[%c9, %c0_63] : memref<27x512xf32, #tpu.memory_space<vmem>>, vector<1x512xf32>
    %164 = vector.broadcast %163 : vector<1x512xf32> to vector<2x512xf32>
    %165 = arith.mulf %162, %164 : vector<2x512xf32>
    %c18 = arith.constant 18 : index
    %c0_64 = arith.constant 0 : index
    %166 = vector.load %arg12[%c18, %c0_64] : memref<54x512xf32, #tpu.memory_space<vmem>>, vector<2x512xf32>
    tpu.vector_store %arg12[%c18, %c0_64], %165 {strides = array<i32>} : memref<54x512xf32, #tpu.memory_space<vmem>>, vector<2x512xf32>,
    %c8_i32 = arith.constant 8 : i32
    %167 = tpu.dynamic_rotate %114 by %c8_i32 dim 1 : vector<2x512xf32>, i32 -> vector<2x512xf32>
    %c10_65 = arith.constant 10 : index
    %c0_66 = arith.constant 0 : index
    %168 = vector.load %arg10[%c10_65, %c0_66] : memref<27x512xf32, #tpu.memory_space<vmem>>, vector<1x512xf32>
    %169 = vector.broadcast %168 : vector<1x512xf32> to vector<2x512xf32>
    %170 = arith.mulf %167, %169 : vector<2x512xf32>
    %c20 = arith.constant 20 : index
    %c0_67 = arith.constant 0 : index
    %171 = vector.load %arg12[%c20, %c0_67] : memref<54x512xf32, #tpu.memory_space<vmem>>, vector<2x512xf32>
    tpu.vector_store %arg12[%c20, %c0_67], %170 {strides = array<i32>} : memref<54x512xf32, #tpu.memory_space<vmem>>, vector<2x512xf32>,
    %c7_i32 = arith.constant 7 : i32
    %172 = tpu.dynamic_rotate %114 by %c7_i32 dim 1 : vector<2x512xf32>, i32 -> vector<2x512xf32>
    %c11 = arith.constant 11 : index
    %c0_68 = arith.constant 0 : index
    %173 = vector.load %arg10[%c11, %c0_68] : memref<27x512xf32, #tpu.memory_space<vmem>>, vector<1x512xf32>
    %174 = vector.broadcast %173 : vector<1x512xf32> to vector<2x512xf32>
    %175 = arith.mulf %172, %174 : vector<2x512xf32>
    %c22 = arith.constant 22 : index
    %c0_69 = arith.constant 0 : index
    %176 = vector.load %arg12[%c22, %c0_69] : memref<54x512xf32, #tpu.memory_space<vmem>>, vector<2x512xf32>
    tpu.vector_store %arg12[%c22, %c0_69], %175 {strides = array<i32>} : memref<54x512xf32, #tpu.memory_space<vmem>>, vector<2x512xf32>,
    %c1_i32 = arith.constant 1 : i32
    %177 = tpu.dynamic_rotate %114 by %c1_i32 dim 1 : vector<2x512xf32>, i32 -> vector<2x512xf32>
    %c12_70 = arith.constant 12 : index
    %c0_71 = arith.constant 0 : index
    %178 = vector.load %arg10[%c12_70, %c0_71] : memref<27x512xf32, #tpu.memory_space<vmem>>, vector<1x512xf32>
    %179 = vector.broadcast %178 : vector<1x512xf32> to vector<2x512xf32>
    %180 = arith.mulf %177, %179 : vector<2x512xf32>
    %c24 = arith.constant 24 : index
    %c0_72 = arith.constant 0 : index
    %181 = vector.load %arg12[%c24, %c0_72] : memref<54x512xf32, #tpu.memory_space<vmem>>, vector<2x512xf32>
    tpu.vector_store %arg12[%c24, %c0_72], %180 {strides = array<i32>} : memref<54x512xf32, #tpu.memory_space<vmem>>, vector<2x512xf32>,
    %c26 = arith.constant 26 : index
    %c0_73 = arith.constant 0 : index
    %182 = vector.load %arg12[%c26, %c0_73] : memref<54x512xf32, #tpu.memory_space<vmem>>, vector<2x512xf32>
    tpu.vector_store %arg12[%c26, %c0_73], %114 {strides = array<i32>} : memref<54x512xf32, #tpu.memory_space<vmem>>, vector<2x512xf32>,
    %c511_i32 = arith.constant 511 : i32
    %183 = tpu.dynamic_rotate %114 by %c511_i32 dim 1 : vector<2x512xf32>, i32 -> vector<2x512xf32>
    %c14_74 = arith.constant 14 : index
    %c0_75 = arith.constant 0 : index
    %184 = vector.load %arg10[%c14_74, %c0_75] : memref<27x512xf32, #tpu.memory_space<vmem>>, vector<1x512xf32>
    %185 = vector.broadcast %184 : vector<1x512xf32> to vector<2x512xf32>
    %186 = arith.mulf %183, %185 : vector<2x512xf32>
    %c28 = arith.constant 28 : index
    %c0_76 = arith.constant 0 : index
    %187 = vector.load %arg12[%c28, %c0_76] : memref<54x512xf32, #tpu.memory_space<vmem>>, vector<2x512xf32>
    tpu.vector_store %arg12[%c28, %c0_76], %186 {strides = array<i32>} : memref<54x512xf32, #tpu.memory_space<vmem>>, vector<2x512xf32>,
    %c505_i32 = arith.constant 505 : i32
    %188 = tpu.dynamic_rotate %114 by %c505_i32 dim 1 : vector<2x512xf32>, i32 -> vector<2x512xf32>
    %c15 = arith.constant 15 : index
    %c0_77 = arith.constant 0 : index
    %189 = vector.load %arg10[%c15, %c0_77] : memref<27x512xf32, #tpu.memory_space<vmem>>, vector<1x512xf32>
    %190 = vector.broadcast %189 : vector<1x512xf32> to vector<2x512xf32>
    %191 = arith.mulf %188, %190 : vector<2x512xf32>
    %c30 = arith.constant 30 : index
    %c0_78 = arith.constant 0 : index
    %192 = vector.load %arg12[%c30, %c0_78] : memref<54x512xf32, #tpu.memory_space<vmem>>, vector<2x512xf32>
    tpu.vector_store %arg12[%c30, %c0_78], %191 {strides = array<i32>} : memref<54x512xf32, #tpu.memory_space<vmem>>, vector<2x512xf32>,
    %c504_i32 = arith.constant 504 : i32
    %193 = tpu.dynamic_rotate %114 by %c504_i32 dim 1 : vector<2x512xf32>, i32 -> vector<2x512xf32>
    %c16_79 = arith.constant 16 : index
    %c0_80 = arith.constant 0 : index
    %194 = vector.load %arg10[%c16_79, %c0_80] : memref<27x512xf32, #tpu.memory_space<vmem>>, vector<1x512xf32>
    %195 = vector.broadcast %194 : vector<1x512xf32> to vector<2x512xf32>
    %196 = arith.mulf %193, %195 : vector<2x512xf32>
    %c32 = arith.constant 32 : index
    %c0_81 = arith.constant 0 : index
    %197 = vector.load %arg12[%c32, %c0_81] : memref<54x512xf32, #tpu.memory_space<vmem>>, vector<2x512xf32>
    tpu.vector_store %arg12[%c32, %c0_81], %196 {strides = array<i32>} : memref<54x512xf32, #tpu.memory_space<vmem>>, vector<2x512xf32>,
    %c503_i32 = arith.constant 503 : i32
    %198 = tpu.dynamic_rotate %114 by %c503_i32 dim 1 : vector<2x512xf32>, i32 -> vector<2x512xf32>
    %c17 = arith.constant 17 : index
    %c0_82 = arith.constant 0 : index
    %199 = vector.load %arg10[%c17, %c0_82] : memref<27x512xf32, #tpu.memory_space<vmem>>, vector<1x512xf32>
    %200 = vector.broadcast %199 : vector<1x512xf32> to vector<2x512xf32>
    %201 = arith.mulf %198, %200 : vector<2x512xf32>
    %c34 = arith.constant 34 : index
    %c0_83 = arith.constant 0 : index
    %202 = vector.load %arg12[%c34, %c0_83] : memref<54x512xf32, #tpu.memory_space<vmem>>, vector<2x512xf32>
    tpu.vector_store %arg12[%c34, %c0_83], %201 {strides = array<i32>} : memref<54x512xf32, #tpu.memory_space<vmem>>, vector<2x512xf32>,
    %c457_i32 = arith.constant 457 : i32
    %203 = tpu.dynamic_rotate %114 by %c457_i32 dim 1 : vector<2x512xf32>, i32 -> vector<2x512xf32>
    %c18_84 = arith.constant 18 : index
    %c0_85 = arith.constant 0 : index
    %204 = vector.load %arg10[%c18_84, %c0_85] : memref<27x512xf32, #tpu.memory_space<vmem>>, vector<1x512xf32>
    %205 = vector.broadcast %204 : vector<1x512xf32> to vector<2x512xf32>
    %206 = arith.mulf %203, %205 : vector<2x512xf32>
    %c36 = arith.constant 36 : index
    %c0_86 = arith.constant 0 : index
    %207 = vector.load %arg12[%c36, %c0_86] : memref<54x512xf32, #tpu.memory_space<vmem>>, vector<2x512xf32>
    tpu.vector_store %arg12[%c36, %c0_86], %206 {strides = array<i32>} : memref<54x512xf32, #tpu.memory_space<vmem>>, vector<2x512xf32>,
    %c456_i32 = arith.constant 456 : i32
    %208 = tpu.dynamic_rotate %114 by %c456_i32 dim 1 : vector<2x512xf32>, i32 -> vector<2x512xf32>
    %c19 = arith.constant 19 : index
    %c0_87 = arith.constant 0 : index
    %209 = vector.load %arg10[%c19, %c0_87] : memref<27x512xf32, #tpu.memory_space<vmem>>, vector<1x512xf32>
    %210 = vector.broadcast %209 : vector<1x512xf32> to vector<2x512xf32>
    %211 = arith.mulf %208, %210 : vector<2x512xf32>
    %c38 = arith.constant 38 : index
    %c0_88 = arith.constant 0 : index
    %212 = vector.load %arg12[%c38, %c0_88] : memref<54x512xf32, #tpu.memory_space<vmem>>, vector<2x512xf32>
    tpu.vector_store %arg12[%c38, %c0_88], %211 {strides = array<i32>} : memref<54x512xf32, #tpu.memory_space<vmem>>, vector<2x512xf32>,
    %c455_i32 = arith.constant 455 : i32
    %213 = tpu.dynamic_rotate %114 by %c455_i32 dim 1 : vector<2x512xf32>, i32 -> vector<2x512xf32>
    %c20_89 = arith.constant 20 : index
    %c0_90 = arith.constant 0 : index
    %214 = vector.load %arg10[%c20_89, %c0_90] : memref<27x512xf32, #tpu.memory_space<vmem>>, vector<1x512xf32>
    %215 = vector.broadcast %214 : vector<1x512xf32> to vector<2x512xf32>
    %216 = arith.mulf %213, %215 : vector<2x512xf32>
    %c40 = arith.constant 40 : index
    %c0_91 = arith.constant 0 : index
    %217 = vector.load %arg12[%c40, %c0_91] : memref<54x512xf32, #tpu.memory_space<vmem>>, vector<2x512xf32>
    tpu.vector_store %arg12[%c40, %c0_91], %216 {strides = array<i32>} : memref<54x512xf32, #tpu.memory_space<vmem>>, vector<2x512xf32>,
    %c449_i32 = arith.constant 449 : i32
    %218 = tpu.dynamic_rotate %114 by %c449_i32 dim 1 : vector<2x512xf32>, i32 -> vector<2x512xf32>
    %c21 = arith.constant 21 : index
    %c0_92 = arith.constant 0 : index
    %219 = vector.load %arg10[%c21, %c0_92] : memref<27x512xf32, #tpu.memory_space<vmem>>, vector<1x512xf32>
    %220 = vector.broadcast %219 : vector<1x512xf32> to vector<2x512xf32>
    %221 = arith.mulf %218, %220 : vector<2x512xf32>
    %c42 = arith.constant 42 : index
    %c0_93 = arith.constant 0 : index
    %222 = vector.load %arg12[%c42, %c0_93] : memref<54x512xf32, #tpu.memory_space<vmem>>, vector<2x512xf32>
    tpu.vector_store %arg12[%c42, %c0_93], %221 {strides = array<i32>} : memref<54x512xf32, #tpu.memory_space<vmem>>, vector<2x512xf32>,
    %c448_i32 = arith.constant 448 : i32
    %223 = tpu.dynamic_rotate %114 by %c448_i32 dim 1 : vector<2x512xf32>, i32 -> vector<2x512xf32>
    %c22_94 = arith.constant 22 : index
    %c0_95 = arith.constant 0 : index
    %224 = vector.load %arg10[%c22_94, %c0_95] : memref<27x512xf32, #tpu.memory_space<vmem>>, vector<1x512xf32>
    %225 = vector.broadcast %224 : vector<1x512xf32> to vector<2x512xf32>
    %226 = arith.mulf %223, %225 : vector<2x512xf32>
    %c44 = arith.constant 44 : index
    %c0_96 = arith.constant 0 : index
    %227 = vector.load %arg12[%c44, %c0_96] : memref<54x512xf32, #tpu.memory_space<vmem>>, vector<2x512xf32>
    tpu.vector_store %arg12[%c44, %c0_96], %226 {strides = array<i32>} : memref<54x512xf32, #tpu.memory_space<vmem>>, vector<2x512xf32>,
    %c447_i32 = arith.constant 447 : i32
    %228 = tpu.dynamic_rotate %114 by %c447_i32 dim 1 : vector<2x512xf32>, i32 -> vector<2x512xf32>
    %c23 = arith.constant 23 : index
    %c0_97 = arith.constant 0 : index
    %229 = vector.load %arg10[%c23, %c0_97] : memref<27x512xf32, #tpu.memory_space<vmem>>, vector<1x512xf32>
    %230 = vector.broadcast %229 : vector<1x512xf32> to vector<2x512xf32>
    %231 = arith.mulf %228, %230 : vector<2x512xf32>
    %c46 = arith.constant 46 : index
    %c0_98 = arith.constant 0 : index
    %232 = vector.load %arg12[%c46, %c0_98] : memref<54x512xf32, #tpu.memory_space<vmem>>, vector<2x512xf32>
    tpu.vector_store %arg12[%c46, %c0_98], %231 {strides = array<i32>} : memref<54x512xf32, #tpu.memory_space<vmem>>, vector<2x512xf32>,
    %c441_i32 = arith.constant 441 : i32
    %233 = tpu.dynamic_rotate %114 by %c441_i32 dim 1 : vector<2x512xf32>, i32 -> vector<2x512xf32>
    %c24_99 = arith.constant 24 : index
    %c0_100 = arith.constant 0 : index
    %234 = vector.load %arg10[%c24_99, %c0_100] : memref<27x512xf32, #tpu.memory_space<vmem>>, vector<1x512xf32>
    %235 = vector.broadcast %234 : vector<1x512xf32> to vector<2x512xf32>
    %236 = arith.mulf %233, %235 : vector<2x512xf32>
    %c48 = arith.constant 48 : index
    %c0_101 = arith.constant 0 : index
    %237 = vector.load %arg12[%c48, %c0_101] : memref<54x512xf32, #tpu.memory_space<vmem>>, vector<2x512xf32>
    tpu.vector_store %arg12[%c48, %c0_101], %236 {strides = array<i32>} : memref<54x512xf32, #tpu.memory_space<vmem>>, vector<2x512xf32>,
    %c440_i32 = arith.constant 440 : i32
    %238 = tpu.dynamic_rotate %114 by %c440_i32 dim 1 : vector<2x512xf32>, i32 -> vector<2x512xf32>
    %c25 = arith.constant 25 : index
    %c0_102 = arith.constant 0 : index
    %239 = vector.load %arg10[%c25, %c0_102] : memref<27x512xf32, #tpu.memory_space<vmem>>, vector<1x512xf32>
    %240 = vector.broadcast %239 : vector<1x512xf32> to vector<2x512xf32>
    %241 = arith.mulf %238, %240 : vector<2x512xf32>
    %c50 = arith.constant 50 : index
    %c0_103 = arith.constant 0 : index
    %242 = vector.load %arg12[%c50, %c0_103] : memref<54x512xf32, #tpu.memory_space<vmem>>, vector<2x512xf32>
    tpu.vector_store %arg12[%c50, %c0_103], %241 {strides = array<i32>} : memref<54x512xf32, #tpu.memory_space<vmem>>, vector<2x512xf32>,
    %c439_i32 = arith.constant 439 : i32
    %243 = tpu.dynamic_rotate %114 by %c439_i32 dim 1 : vector<2x512xf32>, i32 -> vector<2x512xf32>
    %c26_104 = arith.constant 26 : index
    %c0_105 = arith.constant 0 : index
    %244 = vector.load %arg10[%c26_104, %c0_105] : memref<27x512xf32, #tpu.memory_space<vmem>>, vector<1x512xf32>
    %245 = vector.broadcast %244 : vector<1x512xf32> to vector<2x512xf32>
    %246 = arith.mulf %243, %245 : vector<2x512xf32>
    %c52 = arith.constant 52 : index
    %c0_106 = arith.constant 0 : index
    %247 = vector.load %arg12[%c52, %c0_106] : memref<54x512xf32, #tpu.memory_space<vmem>>, vector<2x512xf32>
    tpu.vector_store %arg12[%c52, %c0_106], %246 {strides = array<i32>} : memref<54x512xf32, #tpu.memory_space<vmem>>, vector<2x512xf32>,
    %c0_107 = arith.constant 0 : index
    %c0_108 = arith.constant 0 : index
    %248 = vector.load %arg7[%c0_107, %c0_108] : memref<8x54xf32, #tpu.memory_space<vmem>>, vector<8x54xf32>
    %c0_109 = arith.constant 0 : index
    %c0_110 = arith.constant 0 : index
    %249 = vector.load %arg12[%c0_109, %c0_110] : memref<54x512xf32, #tpu.memory_space<vmem>>, vector<54x512xf32>
    %cst_111 = arith.constant dense<0.000000e+00> : vector<8x512xf32>
    %250 = tpu.matmul %248, %249, %cst_111 {dimension_numbers = #tpu.dot_dimension_numbers<[1], [0], [0], [1], [0, 0, 1, 1], [], []>} : vector<8x54xf32>, vector<54x512xf32>, vector<8x512xf32> -> vector<8x512xf32>
    %c0_112 = arith.constant 0 : index
    %c0_113 = arith.constant 0 : index
    %251 = vector.load %arg8[%c0_112, %c0_113] : memref<8x1xf32, #tpu.memory_space<vmem>>, vector<8x1xf32>
    %252 = vector.broadcast %251 : vector<8x1xf32> to vector<8x512xf32>
    %253 = arith.addf %250, %252 : vector<8x512xf32>
    %c0_114 = arith.constant 0 : index
    %c0_115 = arith.constant 0 : index
    %254 = vector.load %arg9[%c0_114, %c0_115] : memref<6x2xf32, #tpu.memory_space<vmem>>, vector<6x2xf32>
    %cst_116 = arith.constant dense<0.000000e+00> : vector<6x512xf32>
    %255 = tpu.matmul %254, %116, %cst_116 {dimension_numbers = #tpu.dot_dimension_numbers<[1], [0], [0], [1], [0, 0, 1, 1], [], []>} : vector<6x2xf32>, vector<2x512xf32>, vector<6x512xf32> -> vector<6x512xf32>
    %cst_117 = arith.constant dense<0.000000e+00> : vector<8xf32>
    %256 = vector.multi_reduction <add>, %253, %cst_117 [1] : vector<8x512xf32> to vector<8xf32>
    %257 = vector.shape_cast %256 : vector<8xf32> to vector<8x1xf32>
    %cst_118 = arith.constant 0.001953125 : f32
    %258 = vector.broadcast %cst_118 : f32 to vector<8x1xf32>
    %259 = arith.mulf %257, %258 : vector<8x1xf32>
    %cst_119 = arith.constant dense<0.000000e+00> : vector<6xf32>
    %260 = vector.multi_reduction <add>, %255, %cst_119 [1] : vector<6x512xf32> to vector<6xf32>
    %261 = vector.shape_cast %260 : vector<6xf32> to vector<6x1xf32>
    %cst_120 = arith.constant 0.001953125 : f32
    %262 = vector.broadcast %cst_120 : f32 to vector<6x1xf32>
    %263 = arith.mulf %261, %262 : vector<6x1xf32>
    %cst_121 = arith.constant dense<0.000000e+00> : vector<2xf32>
    %264 = vector.multi_reduction <add>, %116, %cst_121 [1] : vector<2x512xf32> to vector<2xf32>
    %265 = vector.shape_cast %264 : vector<2xf32> to vector<2x1xf32>
    %cst_122 = arith.constant 0.001953125 : f32
    %266 = vector.broadcast %cst_122 : f32 to vector<2x1xf32>
    %267 = arith.mulf %265, %266 : vector<2x1xf32>
    %cst_123 = arith.constant dense<0xFF800000> : vector<1xf32>
    %268 = vector.multi_reduction <maximumf>, %259, %cst_123 [0] : vector<8x1xf32> to vector<1xf32>
    %269 = vector.shape_cast %268 : vector<1xf32> to vector<1x1xf32>
    %cst_124 = arith.constant dense<0xFF800000> : vector<1xf32>
    %270 = vector.multi_reduction <maximumf>, %263, %cst_124 [0] : vector<6x1xf32> to vector<1xf32>
    %271 = vector.shape_cast %270 : vector<1xf32> to vector<1x1xf32>
    %cst_125 = arith.constant dense<0xFF800000> : vector<1xf32>
    %272 = vector.multi_reduction <maximumf>, %267, %cst_125 [0] : vector<2x1xf32> to vector<1xf32>
    %273 = vector.shape_cast %272 : vector<1xf32> to vector<1x1xf32>
    %274 = arith.maximumf %271, %273 : vector<1x1xf32>
    %275 = arith.maximumf %269, %274 : vector<1x1xf32>
    %276 = vector.broadcast %275 : vector<1x1xf32> to vector<8x1xf32>
    %277 = arith.subf %259, %276 : vector<8x1xf32>
    %278 = math.exp %277 : vector<8x1xf32>
    %279 = vector.broadcast %275 : vector<1x1xf32> to vector<6x1xf32>
    %280 = arith.subf %263, %279 : vector<6x1xf32>
    %281 = math.exp %280 : vector<6x1xf32>
    %282 = vector.broadcast %275 : vector<1x1xf32> to vector<2x1xf32>
    %283 = arith.subf %267, %282 : vector<2x1xf32>
    %284 = math.exp %283 : vector<2x1xf32>
    %cst_126 = arith.constant dense<0.000000e+00> : vector<1xf32>
    %285 = vector.multi_reduction <add>, %278, %cst_126 [0] : vector<8x1xf32> to vector<1xf32>
    %286 = vector.shape_cast %285 : vector<1xf32> to vector<1x1xf32>
    %cst_127 = arith.constant dense<0.000000e+00> : vector<1xf32>
    %287 = vector.multi_reduction <add>, %281, %cst_127 [0] : vector<6x1xf32> to vector<1xf32>
    %288 = vector.shape_cast %287 : vector<1xf32> to vector<1x1xf32>
    %289 = arith.addf %286, %288 : vector<1x1xf32>
    %cst_128 = arith.constant dense<0.000000e+00> : vector<1xf32>
    %290 = vector.multi_reduction <add>, %284, %cst_128 [0] : vector<2x1xf32> to vector<1xf32>
    %291 = vector.shape_cast %290 : vector<1xf32> to vector<1x1xf32>
    %292 = arith.addf %289, %291 : vector<1x1xf32>
    %cst_129 = arith.constant 1.000000e+00 : f32
    %293 = vector.broadcast %cst_129 : f32 to vector<1x1xf32>
    %294 = arith.divf %293, %292 : vector<1x1xf32>
    %295 = vector.broadcast %294 : vector<1x1xf32> to vector<8x1xf32>
    %296 = arith.mulf %278, %295 : vector<8x1xf32>
    %297 = vector.broadcast %294 : vector<1x1xf32> to vector<6x1xf32>
    %298 = arith.mulf %281, %297 : vector<6x1xf32>
    %299 = vector.broadcast %294 : vector<1x1xf32> to vector<2x1xf32>
    %300 = arith.mulf %284, %299 : vector<2x1xf32>
    %301 = vector.extract_strided_slice %296 {offsets = [0, 0], sizes = [6, 1], strides = [1, 1]} : vector<8x1xf32> to vector<6x1xf32>
    %302 = vector.extract_strided_slice %253 {offsets = [0, 0], sizes = [6, 512], strides = [1, 1]} : vector<8x512xf32> to vector<6x512xf32>
    %303 = vector.broadcast %301 : vector<6x1xf32> to vector<6x512xf32>
    %304 = arith.mulf %303, %302 : vector<6x512xf32>
    %305 = vector.broadcast %298 : vector<6x1xf32> to vector<6x512xf32>
    %306 = arith.mulf %305, %255 : vector<6x512xf32>
    %307 = arith.addf %304, %306 : vector<6x512xf32>
    %c0_130 = arith.constant 0 : index
    %c0_131 = arith.constant 0 : index
    %c0_132 = arith.constant 0 : index
    %308 = vector.load %arg11[%c0_130, %c0_131, %c0_132] : memref<1x8x512xf32, #tpu.memory_space<vmem>>, vector<1x6x512xf32>
    %309 = vector.shape_cast %308 : vector<1x6x512xf32> to vector<6x512xf32>
    %310 = vector.shape_cast %307 : vector<6x512xf32> to vector<1x6x512xf32>
    tpu.vector_store %arg11[%c0_130, %c0_131, %c0_132], %310 {strides = array<i32>} : memref<1x8x512xf32, #tpu.memory_space<vmem>>, vector<1x6x512xf32>,
    %311 = vector.extract_strided_slice %296 {offsets = [6, 0], sizes = [2, 1], strides = [1, 1]} : vector<8x1xf32> to vector<2x1xf32>
    %312 = vector.extract_strided_slice %253 {offsets = [6, 0], sizes = [2, 512], strides = [1, 1]} : vector<8x512xf32> to vector<2x512xf32>
    %313 = vector.broadcast %311 : vector<2x1xf32> to vector<2x512xf32>
    %314 = arith.mulf %313, %312 : vector<2x512xf32>
    %315 = vector.broadcast %300 : vector<2x1xf32> to vector<2x512xf32>
    %316 = arith.mulf %315, %116 : vector<2x512xf32>
    %317 = arith.addf %314, %316 : vector<2x512xf32>
    %c0_133 = arith.constant 0 : index
    %c6_134 = arith.constant 6 : index
    %c0_135 = arith.constant 0 : index
    %318 = vector.load %arg11[%c0_133, %c6_134, %c0_135] : memref<1x8x512xf32, #tpu.memory_space<vmem>>, vector<1x2x512xf32>
    %319 = vector.shape_cast %318 : vector<1x2x512xf32> to vector<2x512xf32>
    %320 = vector.shape_cast %317 : vector<2x512xf32> to vector<1x2x512xf32>
    tpu.vector_store %arg11[%c0_133, %c6_134, %c0_135], %320 {strides = array<i32>} : memref<1x8x512xf32, #tpu.memory_space<vmem>>, vector<1x2x512xf32>,
    return
  }
  func.func @transform_0(%arg0: i32) -> (i32, i32, i32) {
    %c0_i32 = arith.constant 0 : i32
    %c0_i32_0 = arith.constant 0 : i32
    %c0_i32_1 = arith.constant 0 : i32
    return %arg0, %c0_i32, %c0_i32_0 : i32, i32, i32
  }
  func.func @transform_1(%arg0: i32) -> (i32, i32) {
    %c0_i32 = arith.constant 0 : i32
    %c0_i32_0 = arith.constant 0 : i32
    %c0_i32_1 = arith.constant 0 : i32
    return %c0_i32, %c0_i32_0 : i32, i32
  }
  func.func @transform_2(%arg0: i32) -> (i32, i32) {
    %c0_i32 = arith.constant 0 : i32
    %c0_i32_0 = arith.constant 0 : i32
    %c0_i32_1 = arith.constant 0 : i32
    return %c0_i32, %c0_i32_0 : i32, i32
  }
  func.func @transform_3(%arg0: i32) -> (i32, i32) {
    %c0_i32 = arith.constant 0 : i32
    %c0_i32_0 = arith.constant 0 : i32
    %c0_i32_1 = arith.constant 0 : i32
    return %c0_i32, %c0_i32_0 : i32, i32
  }
  func.func @transform_4(%arg0: i32) -> (i32, i32) {
    %c0_i32 = arith.constant 0 : i32
    %c0_i32_0 = arith.constant 0 : i32
    %c0_i32_1 = arith.constant 0 : i32
    return %c0_i32, %c0_i32_0 : i32, i32
  }
  func.func @transform_5(%arg0: i32) -> (i32, i32) {
    %c0_i32 = arith.constant 0 : i32
    %c0_i32_0 = arith.constant 0 : i32
    %c0_i32_1 = arith.constant 0 : i32
    return %c0_i32, %c0_i32_0 : i32, i32
  }
  func.func @transform_6(%arg0: i32) -> (i32, i32) {
    %c0_i32 = arith.constant 0 : i32
    %c0_i32_0 = arith.constant 0 : i32
    %c0_i32_1 = arith.constant 0 : i32
    return %c0_i32, %c0_i32_0 : i32, i32
  }
  func.func @transform_7(%arg0: i32) -> (i32, i32) {
    %c0_i32 = arith.constant 0 : i32
    %c0_i32_0 = arith.constant 0 : i32
    %c0_i32_1 = arith.constant 0 : i32
    return %c0_i32, %c0_i32_0 : i32, i32
  }
  func.func @transform_8(%arg0: i32) -> (i32, i32) {
    %c0_i32 = arith.constant 0 : i32
    %c0_i32_0 = arith.constant 0 : i32
    %c0_i32_1 = arith.constant 0 : i32
    return %c0_i32, %c0_i32_0 : i32, i32
  }
  func.func @transform_9(%arg0: i32) -> (i32, i32) {
    %c0_i32 = arith.constant 0 : i32
    %c0_i32_0 = arith.constant 0 : i32
    %c0_i32_1 = arith.constant 0 : i32
    return %c0_i32, %c0_i32_0 : i32, i32
  }
  func.func @transform_10(%arg0: i32) -> (i32, i32, i32) {
    %c0_i32 = arith.constant 0 : i32
    %c0_i32_0 = arith.constant 0 : i32
    %c0_i32_1 = arith.constant 0 : i32
    return %arg0, %c0_i32, %c0_i32_0 : i32, i32, i32
  }
}

</mosaic_0001>

<bundles_post_ra>
// kernel: scconv_pallas.1
= control target key start
LH: loop header
LB: loop body
LE: loop exit
PB: predicated region body
PF: predicated region fallthrough
CT: control target
= control target key end

     0   :  { %s2911_s13 = smov 0   ;;  %s4108_s0 = inlined_call_operand.vmem [shape: f32[2,8,512], index: 0, kind: input, shape index: {}]   ;;  %s4109_s1 = inlined_call_operand.vmem [shape: f32[8,1], index: 1, kind: input, shape index: {}]   ;;  %s4110_s2 = inlined_call_operand.vmem [shape: f32[8,1], index: 2, kind: input, shape index: {}]   ;;  %s4111_s3 = inlined_call_operand.vmem [shape: f32[8,1], index: 3, kind: input, shape index: {}]   ;;  %s4112_s4 = inlined_call_operand.vmem [shape: f32[2,4], index: 4, kind: input, shape index: {}]   ;;  %s4113_s5 = inlined_call_operand.vmem [shape: f32[2,4], index: 5, kind: input, shape index: {}]   ;;  %s4114_s6 = inlined_call_operand.vmem [shape: f32[8,54], index: 6, kind: input, shape index: {}]   ;;  %s4115_s7 = inlined_call_operand.vmem [shape: f32[8,1], index: 7, kind: input, shape index: {}]   ;;  %s4116_s8 = inlined_call_operand.vmem [shape: f32[6,2], index: 8, kind: input, shape index: {}]   ;;  %s4117_s9 = inlined_call_operand.vmem [shape: f32[27,512], index: 9, kind: input, shape index: {}]   ;;  %s4118_s10 = inlined_call_operand.vmem [shape: f32[2,8,512], index: 10, kind: output, shape index: {}]  }
   0x1 LB: > { %s2684_s14 = sadd.s32 4294967295, %s2835_s13   ;;  %p2688_p0 = scmp.ge.s32.totalorder %s2835_s13, 1  ;;  %s2835_s13 = sphi %s2911_s13, %s20_s13  }
   0x2   : > { %p312_p1 = scmp.lt.s32.totalorder %s2835_s13, 3 }
   0x4   : > { %p313_p2 = pnand %p2688_p0, %p312_p1 }
   0x6   : > { %316 = sbr.rel (%p313_p2) target bundleno = 1338 (0x53a), region = 60 }
   0xd   : > { %p350_p3 = scmp.lt.s32.totalorder %s2684_s14, 1  ;;  %v2837_v14 = vmov 0   ;;  %v494_v15 = vld [vmem:[%s4111_s3] sm:$0xff]  ;;  %vm380_vm0 = vcmask 1041408   ;;  %vm421_vm1 = vcmask 1043456   ;;  %vm423_vm2 = vcmask 1045504  }
   0xe   : > { %2801 = vset.pattern.permute.xlu1 %v2837_v14  ;;  %2802 = vset.pattern.permute.xlu0 %v2837_v14  ;;  %vm565_vm7 = vcmask 31744   ;;  %s2839_s29 = smov 72   ;;  %s2840_s30 = smov 71  }
   0xf   : > { %s4269_s14 = smov (!%p350_p3, %s2684_s14), 1  ;;  %s2841_s11 = smov 65  }
  0x10   : > { %s2748_s15 = sshll.u32 %s4269_s14, 5  ;;  %s2842_s12 = smov 63  }
  0x11   : > { %s354_s18 = scalar_lea.vmem %s4108_s0, %s2748_s15  ;;  %s2843_s16 = smov 56  }
  0x12   : > { %v2927_v0 = vld [vmem:[%s354_s18] sm:$0xff]  ;;  %v2929_v1 = vld [vmem:[%s354_s18 + $0x8] sm:$0xff]  ;;  %v2931_v2 = vld [vmem:[%s354_s18 + $0x10] sm:$0xff]  ;;  %s2844_s17 = smov 57   ;;  %s2846_s19 = smov 121  }
  0x13   : > { %v364_v3 = vadd.f32 %v2929_v1, %v2927_v0  ;;  %v370_v4 = vmul.f32 %v2927_v0, %v2927_v0  ;;  %v371_v5 = vmul.f32 %v2929_v1, %v2929_v1  ;;  %v372_v6 = vmul.f32 %v2931_v2, %v2931_v2  ;;  %v2941_v7 = vld [vmem:[%s354_s18 + $0x18] sm:$0xff]  ;;  %s2845_s18 = smov 127   ;;  %s2847_s20 = smov 73  }
  0x14   : > { %v373_v9 = vmul.f32 %v2941_v7, %v2941_v7  ;;  %s2848_s21 = smov 64   ;;  %s2849_s22 = smov 55  }
  0x15   : > { %v365_v8 = vadd.f32 %v364_v3, %v2931_v2  ;;  %v374_v10 = vadd.f32 %v371_v5, %v370_v4  ;;  %s2850_s23 = smov 1   ;;  %s2851_s24 = smov 9  }
  0x16   : > { %s2852_s25 = smov 8   ;;  %s2853_s26 = smov 119  }
  0x17   : > { %v366_v11 = vadd.f32 %v365_v8, %v2941_v7  ;;  %v375_v12 = vadd.f32 %v374_v10, %v372_v6  ;;  %s2854_s27 = smov 7   ;;  %s2855_s28 = smov 120  }
  0x19   : > { %367 = vadd.xlane.f32.xlu0 %v366_v11  ;;  %v376_v13 = vadd.f32 %v375_v12, %v373_v9 }
  0x1d   : > { %377 = vadd.xlane.f32.xlu0 %v376_v13 }
  0x33   : > { %497 = vperm.xlu0 %2802, %v494_v15  }
  0xa6   : > { %v368_v16 = vpop.xlane.xlu0 %367 }
  0xa7   : > { %v369_v17 = vmul.f32 0.001953125, %v368_v16 }
  0xa9   : > { %v381_v18 = vsel %vm380_vm0, %v369_v17, 0.0  ;;  %v390_v19 = vrot.slane %v369_v17, 2  ;;  %v400_v20 = vrot.slane %v369_v17, 4  ;;  %v410_v21 = vrot.slane %v369_v17, 6 }
  0xaa   : > { %v382_v22 = vrot.slane %v381_v18, 4  ;;  %v378_v23 = vpop.xlane.xlu0 %377 }
  0xab   : > { %v392_v24 = vsel %vm380_vm0, %v390_v19, 0.0  ;;  %v402_v25 = vsel %vm380_vm0, %v400_v20, 0.0  ;;  %v412_v26 = vsel %vm380_vm0, %v410_v21, 0.0  ;;  %v379_v27 = vmul.f32 0.001953125, %v378_v23 }
  0xac   : > { %v383_v28 = vadd.f32 %v382_v22, %v381_v18  ;;  %v393_v29 = vrot.slane %v392_v24, 4  ;;  %v403_v30 = vrot.slane %v402_v25, 4  ;;  %v413_v31 = vrot.slane %v412_v26, 4 }
  0xad   : > { %v425_v32 = vsel %vm380_vm0, %v379_v27, 0.0  ;;  %v434_v33 = vrot.slane %v379_v27, 2  ;;  %v444_v34 = vrot.slane %v379_v27, 4  ;;  %v454_v35 = vrot.slane %v379_v27, 6 }
  0xae   : > { %v384_v36 = vrot.slane %v383_v28, 2  ;;  %v394_v37 = vadd.f32 %v393_v29, %v392_v24  ;;  %v404_v38 = vadd.f32 %v403_v30, %v402_v25  ;;  %v414_v39 = vadd.f32 %v413_v31, %v412_v26 }
  0xaf   : > { %v426_v40 = vrot.slane %v425_v32, 4  ;;  %v436_v41 = vsel %vm380_vm0, %v434_v33, 0.0  ;;  %v446_v42 = vsel %vm380_vm0, %v444_v34, 0.0  ;;  %v456_v43 = vsel %vm380_vm0, %v454_v35, 0.0 }
  0xb0   : > { %v385_v44 = vadd.f32 %v384_v36, %v383_v28  ;;  %v395_v45 = vrot.slane %v394_v37, 2  ;;  %v405_v46 = vrot.slane %v404_v38, 2  ;;  %v437_v47 = vrot.slane %v436_v41, 4 }
  0xb1   : > { %v427_v48 = vadd.f32 %v426_v40, %v425_v32  ;;  %v447_v49 = vrot.slane %v446_v42, 4  ;;  %v457_v50 = vrot.slane %v456_v43, 4  ;;  %v415_v51 = vrot.slane %v414_v39, 2 }
  0xb2   : > { %v386_v52 = vrot.slane %v385_v44, 1  ;;  %v396_v53 = vadd.f32 %v395_v45, %v394_v37  ;;  %v406_v54 = vadd.f32 %v405_v46, %v404_v38  ;;  %v438_v55 = vadd.f32 %v437_v47, %v436_v41 }
  0xb3   : > { %v428_v56 = vrot.slane %v427_v48, 2  ;;  %v448_v57 = vadd.f32 %v447_v49, %v446_v42  ;;  %v458_v58 = vadd.f32 %v457_v50, %v456_v43  ;;  %v416_v59 = vadd.f32 %v415_v51, %v414_v39  ;;  %v471_v39 = vld [vmem:[%s4109_s1] sm:$0xff] }
  0xb4   : > { %v387_v60 = vadd.f32 %v386_v52, %v385_v44  ;;  %v397_v61 = vrot.slane %v396_v53, 1  ;;  %v439_v62 = vrot.slane %v438_v55, 2  ;;  %v407_v63 = vrot.slane %v406_v54, 1  ;;  %v473_v42 = vld [vmem:[%s4110_s2] sm:$0xff]  ;;  %v498_v52 = vpop.permute.xlu0 %497 }
  0xb5   : > { %v429_v3 = vadd.f32 %v428_v56, %v427_v48  ;;  %v449_v4 = vrot.slane %v448_v57, 2  ;;  %v459_v5 = vrot.slane %v458_v58, 2  ;;  %v417_v6 = vrot.slane %v416_v59, 1 }
  0xb6   : > { %v440_v8 = vadd.f32 %v439_v62, %v438_v55  ;;  %v398_v9 = vadd.f32 %v397_v61, %v396_v53  ;;  %v408_v10 = vadd.f32 %v407_v63, %v406_v54  ;;  %v388_v16 = vmul.f32 0.5, %v387_v60 }
  0xb7   : > { %v430_v11 = vrot.slane %v429_v3, 1  ;;  %v450_v12 = vadd.f32 %v449_v4, %v448_v57  ;;  %v460_v13 = vadd.f32 %v459_v5, %v458_v58  ;;  %v418_v14 = vadd.f32 %v417_v6, %v416_v59 }
  0xb8   : > { %v441_v15 = vrot.slane %v440_v8, 1  ;;  %v399_v17 = vmul.f32 0.5, %v398_v9  ;;  %v409_v18 = vmul.f32 0.5, %v408_v10  ;;  %v4119_v45 = vmov 0.0  }
  0xb9   : > { %v431_v19 = vadd.f32 %v430_v11, %v429_v3  ;;  %v451_v20 = vrot.slane %v450_v12, 1  ;;  %v461_v21 = vrot.slane %v460_v13, 1  ;;  %v419_v23 = vmul.f32 0.5, %v418_v14  ;;  %645 = vmatprep.mubr.f32.mxu0 %v4119_v45  ;;  %716 = vmatprep.mubr.f32.mxu1 %v4119_v45 }
  0xba   : > { %v442_v22 = vadd.f32 %v441_v15, %v440_v8  ;;  %v420_v24 = vsel %vm380_vm0, %v388_v16, %v399_v17 }
  0xbb   : > { %v452_v25 = vadd.f32 %v451_v20, %v450_v12  ;;  %v422_v26 = vsel %vm421_vm1, %v420_v24, %v409_v18  ;;  %v462_v27 = vadd.f32 %v461_v21, %v460_v13  ;;  %v432_v28 = vmul.f32 0.5, %v431_v19 }
  0xbc   : > { %v443_v29 = vmul.f32 0.5, %v442_v22  ;;  %v424_v30 = vsel %vm423_vm2, %v422_v26, %v419_v23 }
  0xbd   : > { %v453_v31 = vmul.f32 0.5, %v452_v25  ;;  %v463_v32 = vmul.f32 0.5, %v462_v27  ;;  %v467_v35 = vmul.f32 %v424_v30, %v424_v30 }
  0xbe   : > { %v464_v33 = vsel %vm380_vm0, %v432_v28, %v443_v29 }
  0xbf   : > { %v465_v34 = vsel %vm421_vm1, %v464_v33, %v453_v31 }
  0xc0   : > { %v466_v36 = vsel %vm423_vm2, %v465_v34, %v463_v32 }
  0xc1   : > { %v468_v37 = vsub.f32 %v466_v36, %v467_v35 }
  0xc3   : > { %v469_v38 = vadd.f32 1e-05, %v468_v37 }
  0xc5   : > { %2803 = vrsqrt.f32 %v469_v38 }
  0xcf   : > { %v2804_v40 = vpop.eup %2803 }
  0xd0   : > { %v472_v41 = vmul.f32 %v2804_v40, %v471_v39 }
  0xd2   : > { %478 = vperm.xlu1 %2801, %v472_v41   ;;  %v474_v43 = vmul.f32 %v472_v41, %v424_v30 }
  0xd4   : > { %v475_v44 = vsub.f32 %v473_v42, %v474_v43  ;;  %v723_v42 = vld [vmem:[%s4113_s5] sm:$0x3] }
  0xd6   : > { %487 = vperm.xlu1 %2801, %v475_v44  }
 0x151   : > { %v479_v46 = vpop.permute.xlu1 %478 }
 0x152   : > { %v481_v47 = vmul.f32 %v479_v46, %v2927_v0  ;;  %v482_v48 = vmul.f32 %v479_v46, %v2929_v1  ;;  %v483_v49 = vmul.f32 %v479_v46, %v2931_v2  ;;  %v484_v50 = vmul.f32 %v479_v46, %v2941_v7 }
 0x155   : > { %v488_v51 = vpop.permute.xlu1 %487 }
 0x156   : > { %v490_v53 = vadd.f32 %v488_v51, %v481_v47  ;;  %v491_v54 = vadd.f32 %v488_v51, %v482_v48  ;;  %v492_v55 = vadd.f32 %v488_v51, %v483_v49  ;;  %v493_v56 = vadd.f32 %v488_v51, %v484_v50 }
 0x158   : > { %v500_v57 = vmul.f32 %v498_v52, %v490_v53  ;;  %v501_v58 = vmul.f32 %v498_v52, %v491_v54  ;;  %v502_v59 = vmul.f32 %v498_v52, %v492_v55  ;;  %v503_v60 = vmul.f32 %v498_v52, %v493_v56 }
 0x15a   : > { %v2693_v61 = vmul.f32 -1.442695, %v500_v57  ;;  %v2694_v62 = vmul.f32 -1.442695, %v501_v58  ;;  %v2695_v63 = vmul.f32 -1.442695, %v502_v59 }
 0x15b   : > { %v2696_v3 = vmul.f32 -1.442695, %v503_v60 }
 0x15c   : > { %2805 = vpow2.f32 %v2693_v61 }
 0x15d   : > { %2807 = vpow2.f32 %v2694_v62 }
 0x15e   : > { %2809 = vpow2.f32 %v2695_v63 }
 0x15f   : > { %2811 = vpow2.f32 %v2696_v3 }
 0x166   : > { %v2806_v4 = vpop.eup %2805 }
 0x167   : > { %v2808_v5 = vpop.eup %2807  ;;  %v516_v6 = vadd.f32 1.0, %v2806_v4 }
 0x168   : > { %v2810_v8 = vpop.eup %2809  ;;  %v517_v9 = vadd.f32 1.0, %v2808_v5 }
 0x169   : > { %v2812_v10 = vpop.eup %2811  ;;  %v518_v11 = vadd.f32 1.0, %v2810_v8  ;;  %2813 = vrcp.f32 %v516_v6 }
 0x16a   : > { %v519_v12 = vadd.f32 1.0, %v2812_v10  ;;  %2815 = vrcp.f32 %v517_v9 }
 0x16b   : > { %2817 = vrcp.f32 %v518_v11 }
 0x16c   : > { %2819 = vrcp.f32 %v519_v12 }
 0x173   : > { %v2814_v13 = vpop.eup %2813 }
 0x174   : > { %v2816_v14 = vpop.eup %2815  ;;  %vm528_vm3 = vcmp.gt.f32.partialorder %v2814_v13, 0.5 }
 0x175   : > { %v2818_v15 = vpop.eup %2817  ;;  %vm529_vm4 = vcmp.gt.f32.partialorder %v2816_v14, 0.5  ;;  %v532_v16 = vsel %vm528_vm3, 1.0, %v2814_v13  ;;  %v536_v17 = vsel %vm528_vm3, 0.0, %v2814_v13 }
 0x176   : > { %v2820_v18 = vpop.eup %2819  ;;  %v533_v19 = vsel %vm529_vm4, 1.0, %v2816_v14  ;;  %v537_v20 = vsel %vm529_vm4, 0.0, %v2816_v14  ;;  %v544_v21 = vmul.f32 %v536_v17, %v2927_v0  ;;  %v540_v23 = vmul.f32 %v532_v16, %v2927_v0 }
 0x177   : > { %v545_v22 = vmul.f32 %v537_v20, %v2929_v1  ;;  %vm531_vm5 = vcmp.gt.f32.partialorder %v2820_v18, 0.5  ;;  %vm530_vm6 = vcmp.gt.f32.partialorder %v2818_v15, 0.5  ;;  %v541_v24 = vmul.f32 %v533_v19, %v2929_v1  ;;  %v564_v1 = vld [vmem:[%s4112_s4] sm:$0x3] }
 0x178   : > { %v535_v25 = vsel %vm531_vm5, 1.0, %v2820_v18  ;;  %v539_v26 = vsel %vm531_vm5, 0.0, %v2820_v18  ;;  %v552_v27 = vrot.slane %v544_v21, 4  ;;  %v534_v30 = vsel %vm530_vm6, 1.0, %v2818_v15  ;;  %v2182_v20 = vld [vmem:[%s4115_s7] sm:$0xff] }
 0x179   : > { %v553_v28 = vrot.slane %v545_v22, 4  ;;  %v547_v29 = vmul.f32 %v539_v26, %v2941_v7  ;;  %v538_v31 = vsel %vm530_vm6, 0.0, %v2818_v15  ;;  %v543_v35 = vmul.f32 %v535_v25, %v2941_v7 }
 0x17a   : > { %v560_v32 = vadd.f32 %v552_v27, %v540_v23  ;;  %v546_v33 = vmul.f32 %v538_v31, %v2931_v2  ;;  %v542_v0 = vmul.f32 %v534_v30, %v2931_v2  ;;  %v889_v17 = vlaneseq  ;;  %v3206_v30 = vld [vmem:[%s4117_s9 + $0x7] ss:$8 sm:$0xf] }
 0x17b   : > { %v561_v34 = vadd.f32 %v553_v28, %v541_v24  ;;  %v555_v36 = vrot.slane %v547_v29, 4 }
 0x17c   : > { %v554_v37 = vrot.slane %v546_v33, 4  ;;  %v724_v40 = vrot.slane %v560_v32, 4  ;;  %v899_v23 = vshrl.u32 %v889_v17, 7  ;;  %v3199_v28 = vand.u32 127, %v889_v17 }
 0x17d   : > { %2697 = vmatprep.subr.msk.mxu0 %vm421_vm1, %v561_v34  ;;  %v725_v38 = vrot.slane %v561_v34, 4  ;;  %v563_v39 = vadd.f32 %v555_v36, %v543_v35  ;;  %v3217_v34 = vld [vmem:[%s4117_s9 + $0x61] ss:$8 sm:$0xf] }
 0x17e   : > { %2698 = vmatpush1.msk.msra.mxu0 %vm421_vm1, %v560_v32  ;;  %v562_v41 = vadd.f32 %v554_v37, %v542_v0  ;;  %v3201_v29 = vsub.s32 1, %v899_v23  ;;  %v3210_v32 = vsub.s32 0, %v899_v23  ;;  %v3212_v33 = vsub.s32 2, %v899_v23  ;;  %v3226_v0 = vld [vmem:[%s4117_s9 + $0x2] ss:$8 sm:$0xf] }
 0x17f   : > { %2700 = vmatprep.subr.msk.mxu1 %vm421_vm1, %v563_v39  ;;  %v727_v7 = vrot.slane %v563_v39, 4  ;;  %2699 = vmatmul.mubr.msk.f32.vlgmr.msra.gmra.mrb[0].mxu0 %vm565_vm7, %v564_v1  ;;  %v3221_v36 = vsub.s32 3, %v899_v23  ;;  %v3231_v37 = vld [vmem:[%s4117_s9 + $0x44] ss:$8 sm:$0xf]  ;;  %vm1258_vm8 = vcmp.lt.s32.totalorder %v3199_v28, 56 }
 0x180   : > { %2701 = vmatpush1.msk.msra.mxu1 %vm421_vm1, %v562_v41  ;;  %v726_v2 = vrot.slane %v562_v41, 4  ;;  %2703 = vmatprep.subr.msk.mxu0 %vm421_vm1, %v725_v38  ;;  %vm990_vm9 = vcmp.lt.s32.totalorder %v3199_v28, 71  ;;  %v3346_v17 = vld [vmem:[%s4117_s9 + $0x23] ss:$8 sm:$0xf]  ;;  %vm1146_vm10 = vcmp.lt.s32.totalorder %v3199_v28, 63 }
 0x181   : > { %2702 = vmatmul.mubr.msk.f32.vlgmr.msra.gmra.mrb[0].mxu1 %vm565_vm7, %v564_v1  ;;  %2706 = vmatprep.subr.msk.mxu1 %vm421_vm1, %v727_v7  ;;  %v3236_v1 = vld [vmem:[%s4117_s9 + $0x5] ss:$8 sm:$0xf]  ;;  %vm891_vm11 = vcmp.lt.s32.totalorder %v3199_v28, 73  ;;  %vm1102_vm12 = vcmp.lt.s32.totalorder %v3199_v28, 64  ;;  %vm934_vm13 = vcmp.lt.s32.totalorder %v3199_v28, 72 }
 0x182   : > { %2704 = vmatpush1.msk.msra.mxu0 %vm421_vm1, %v724_v40  ;;  %2707 = vmatpush1.msk.msra.mxu1 %vm421_vm1, %v726_v2  ;;  %v3246_v40 = vld [vmem:[%s4117_s9 + $0x47] ss:$8 sm:$0xf]  ;;  %v4165_v2 = vrot.slane %v3206_v30, %v3212_v33  ;;  %vm1358_vm14 = vcmp.lt.s32.totalorder %v3199_v28, 9  ;;  %vm1414_vm15 = vcmp.lt.s32.totalorder %v3199_v28, 8  ;;  %vm1046_vm1 = vcmp.lt.s32.totalorder %v3199_v28, 65 }
 0x183   : > { %803 = vmatprep.mubr.f32.mxu0 %v4119_v45  ;;  %874 = vmatprep.mubr.f32.mxu1 %v4119_v45  ;;  %vm1470_vm3 = vcmp.lt.s32.totalorder %v3199_v28, 7  ;;  %vm1202_vm4 = vcmp.lt.s32.totalorder %v3199_v28, 57  ;;  %vm1314_vm5 = vcmp.lt.s32.totalorder %v3199_v28, 55  ;;  %vm1526_vm6 = vcmp.lt.s32.totalorder %v3199_v28, 1 }
 0x184   : > { %2705 = vmatmul.mubr.msk.f32.vlgmr.msra.gmra.mrb[2].mxu0 %vm565_vm7, %v723_v42 }
 0x185   : > { %2708 = vmatmul.mubr.msk.f32.vlgmr.msra.gmra.mrb[2].mxu1 %vm565_vm7, %v723_v42  ;;  %2268 = vmatprep.mubr.f32.mxu0 %v4119_v45  ;;  %v4164_v42 = vrot.slane %v3206_v30, %v3201_v29  ;;  %vm1642_vm7 = vcmp.lt.s32.totalorder %v3199_v28, 121 }
 0x186   : > { %2339 = vmatprep.mubr.f32.mxu1 %v4119_v45  ;;  %v3359_v45 = vld [vmem:[%s4117_s9 + $0x3] ss:$8 sm:$0xf] }
 0x252   : > { %v3006_v43 = vpop.f32.mrb[0].mxu0 }
 0x253   : > { %926 = vrot.lane.b32.xlu1 %v3006_v43, %s2839_s29  ;;  %v3010_v44 = vpop.f32.mrb[1].mxu0  ;;  %v1566_v46 = vrot.slane %v3006_v43, 6 }
 0x254   : > { %v718_v47 = vpop.f32.mrb[0].mxu1  ;;  %v1567_v48 = vrot.slane %v3010_v44, 6 }
 0x255   : > { %930 = vrot.lane.b32.xlu0 %v718_v47, %s2839_s29  ;;  %v3015_v49 = vpop.f32.mrb[1].mxu1  ;;  %1574 = vst [vmem:[#allocation2 + $0x60] sm:$0xc] %v1566_v46  ;;  %v1568_v50 = vrot.slane %v718_v47, 6 }
 0x256   : > { %1575 = vst [vmem:[#allocation2 + $0x68] sm:$0xc] %v1567_v48  ;;  %v1569_v51 = vrot.slane %v3015_v49, 6  ;;  %v3364_v46 = vld [vmem:[%s4117_s9 + $0x45] ss:$8 sm:$0xf] }
 0x257   : > { %982 = vrot.lane.b32.xlu1 %v3006_v43, %s2840_s30  ;;  %1576 = vst [vmem:[#allocation2 + $0x70] sm:$0xc] %v1568_v50  ;;  %v3164_v9 = vpop.f32.mrb[2].mxu0  ;;  %v3274_v50 = vld [vmem:[%s4117_s9 + $0x42] ss:$8 sm:$0xf] }
 0x258   : > { %1577 = vst [vmem:[#allocation2 + $0x78] sm:$0xc] %v1569_v51  ;;  %4153 = vst [vmem:[#allocation8_spill] sm:$0xff] %v3164_v9  ;;  %v2521_v10 = vsel %vm380_vm0, %v3164_v9, 0.0  ;;  %v3168_v11 = vpop.f32.mrb[3].mxu0  ;;  %v3170_v12 = vpop.f32.mrb[2].mxu1 }
 0x259   : > { %1042 = vrot.lane.b32.xlu0 %v718_v47, %s2841_s11  ;;  %4154 = vst [vmem:[#allocation9_spill] sm:$0xff] %v3168_v11  ;;  %4155 = vst [vmem:[#allocation10_spill] sm:$0xff] %v3170_v12  ;;  %v2522_v14 = vsel %vm380_vm0, %v3168_v11, 0.0  ;;  %v3180_v18 = vpop.f32.mrb[3].mxu1  ;;  %v2524_v21 = vsel %vm380_vm0, %v3170_v12, 0.0 }
 0x25a   : > { %v2523_v15 = vadd.f32 %v2522_v14, %v2521_v10  ;;  %4156 = vst [vmem:[#allocation11_spill] sm:$0xff] %v3180_v18  ;;  %v2526_v26 = vsel %vm380_vm0, %v3180_v18, 0.0  ;;  %v3279_v51 = vld [vmem:[%s4117_s9 + $0x4] ss:$8 sm:$0xf]  ;;  %v4166_v18 = vrot.slane %v3217_v34, %v3210_v32 }
 0x25b   : > { %1038 = vrot.lane.b32.xlu1 %v3006_v43, %s2841_s11  ;;  %v3318_v14 = vld [vmem:[%s4117_s9 + $0x43] ss:$8 sm:$0xf]  ;;  %v3331_v10 = vld [vmem:[%s4117_s9 + $0x22] ss:$8 sm:$0xf] }
 0x25c   : > { %v2525_v25 = vadd.f32 %v2524_v21, %v2523_v15  ;;  %v3297_v21 = vld [vmem:[%s4117_s9 + $0x21] ss:$8 sm:$0xf]  ;;  %v3420_v48 = vld [vmem:[%s4117_s9 + $0x20] ss:$8 sm:$0xf] }
 0x25d   : > { %1142 = vrot.lane.b32.xlu0 %v718_v47, %s2842_s12  ;;  %v3313_v15 = vld [vmem:[%s4117_s9 + $0x1] ss:$8 sm:$0xf]  ;;  %4169 = vst [vmem:[#allocation20_spill] sm:$0xff] %v3420_v48 }
 0x25e   : > { %v3208_v31 = vadd.f32 %v2526_v26, %v2525_v25 }
 0x25f   : > { %1138 = vrot.lane.b32.xlu1 %v3006_v43, %s2842_s12 }
 0x261   : > { %1254 = vrot.lane.b32.xlu0 %v718_v47, %s2843_s16 }
 0x263   : > { %1194 = vrot.lane.b32.xlu1 %v3006_v43, %s2844_s17 }
 0x265   : > { %1582 = vrot.lane.b32.xlu0 %v718_v47, %s2845_s18 }
 0x267   : > { %1250 = vrot.lane.b32.xlu1 %v3006_v43, %s2843_s16 }
 0x269   : > { %1638 = vrot.lane.b32.xlu0 %v718_v47, %s2846_s19 }
 0x26b   : > { %881 = vrot.lane.b32.xlu1 %v3006_v43, %s2847_s20 }
 0x26d   : > { %1098 = vrot.lane.b32.xlu0 %v718_v47, %s2848_s21 }
 0x26f   : > { %1094 = vrot.lane.b32.xlu1 %v3006_v43, %s2848_s21 }
 0x271   : > { %1578 = vrot.lane.b32.xlu0 %v3006_v43, %s2845_s18 }
 0x273   : > { %986 = vrot.lane.b32.xlu1 %v718_v47, %s2840_s30 }
 0x275   : > { %1306 = vrot.lane.b32.xlu0 %v3006_v43, %s2849_s22 }
 0x277   : > { %1198 = vrot.lane.b32.xlu1 %v718_v47, %s2844_s17 }
 0x279   : > { %1518 = vrot.lane.b32.xlu0 %v3006_v43, %s2850_s23 }
 0x27b   : > { %1350 = vrot.lane.b32.xlu1 %v3006_v43, %s2851_s24 }
 0x27d   : > { %1410 = vrot.lane.b32.xlu0 %v718_v47, %s2852_s25 }
 0x27f   : > { %1406 = vrot.lane.b32.xlu1 %v3006_v43, %s2852_s25 }
 0x281   : > { %1738 = vrot.lane.b32.xlu0 %v718_v47, %s2853_s26 }
 0x283   : > { %1462 = vrot.lane.b32.xlu1 %v3006_v43, %s2854_s27 }
 0x285   : > { %1522 = vrot.lane.b32.xlu0 %v718_v47, %s2850_s23 }
 0x287   : > { %885 = vrot.lane.b32.xlu1 %v718_v47, %s2847_s20 }
 0x289   : > { %1690 = vrot.lane.b32.xlu0 %v3006_v43, %s2855_s28 }
 0x28b   : > { %1634 = vrot.lane.b32.xlu1 %v3006_v43, %s2846_s19 }
 0x28d   : > { %1252 = vrot.lane.b32.xlu0 %v3010_v44, %s2843_s16 }
 0x28f   : > { %1354 = vrot.lane.b32.xlu1 %v718_v47, %s2851_s24 }
 0x291   : > { %988 = vrot.lane.b32.xlu0 %v3015_v49, %s2840_s30 }
 0x293   : > { %1466 = vrot.lane.b32.xlu1 %v718_v47, %s2854_s27 }
 0x295   : > { %1144 = vrot.lane.b32.xlu0 %v3015_v49, %s2842_s12 }
 0x297   : > { %1310 = vrot.lane.b32.xlu1 %v718_v47, %s2849_s22 }
 0x299   : > { %1256 = vrot.lane.b32.xlu0 %v3015_v49, %s2843_s16 }
 0x29b   : > { %1734 = vrot.lane.b32.xlu1 %v3006_v43, %s2853_s26  ;;  %v3259_v43 = vld [vmem:[%s4117_s9] ss:$8 sm:$0xf] }
 0x29c   : > { %4160 = vst [vmem:[#allocation15_spill] sm:$0xff] %v3259_v43 }
 0x29d   : > { %883 = vrot.lane.b32.xlu0 %v3010_v44, %s2847_s20 }
 0x29f   : > { %1694 = vrot.lane.b32.xlu1 %v718_v47, %s2855_s28 }
 0x2a1   : > { %1096 = vrot.lane.b32.xlu0 %v3010_v44, %s2848_s21 }
 0x2a3   : > { %928 = vrot.lane.b32.xlu1 %v3010_v44, %s2839_s29 }
 0x2a5   : > { %1352 = vrot.lane.b32.xlu0 %v3010_v44, %s2851_s24 }
 0x2a7   : > { %984 = vrot.lane.b32.xlu1 %v3010_v44, %s2840_s30 }
 0x2a9   : > { %1408 = vrot.lane.b32.xlu0 %v3010_v44, %s2852_s25 }
 0x2ab   : > { %1040 = vrot.lane.b32.xlu1 %v3010_v44, %s2841_s11 }
 0x2ad   : > { %1464 = vrot.lane.b32.xlu0 %v3010_v44, %s2854_s27 }
 0x2af   : > { %1140 = vrot.lane.b32.xlu1 %v3010_v44, %s2842_s12 }
 0x2b1   : > { %1412 = vrot.lane.b32.xlu0 %v3015_v49, %s2852_s25 }
 0x2b3   : > { %1196 = vrot.lane.b32.xlu1 %v3010_v44, %s2844_s17 }
 0x2b5   : > { %1312 = vrot.lane.b32.xlu0 %v3015_v49, %s2849_s22 }
 0x2b7   : > { %932 = vrot.lane.b32.xlu1 %v3015_v49, %s2839_s29 }
 0x2b9   : > { %1524 = vrot.lane.b32.xlu0 %v3015_v49, %s2850_s23 }
 0x2bb   : > { %1044 = vrot.lane.b32.xlu1 %v3015_v49, %s2841_s11 }
 0x2bd   : > { %1640 = vrot.lane.b32.xlu0 %v3015_v49, %s2846_s19 }
 0x2bf   : > { %1200 = vrot.lane.b32.xlu1 %v3015_v49, %s2844_s17 }
 0x2c1   : > { %1692 = vrot.lane.b32.xlu0 %v3010_v44, %s2855_s28 }
 0x2c3   : > { %887 = vrot.lane.b32.xlu1 %v3015_v49, %s2847_s20 }
 0x2c5   : > { %1696 = vrot.lane.b32.xlu0 %v3015_v49, %s2855_s28  ;;  %v3114_v52 = vpop.permute.xlu1 %926 }
 0x2c7   : > { %v3116_v53 = vpop.permute.xlu0 %930  ;;  %1100 = vrot.lane.b32.xlu1 %v3015_v49, %s2848_s21  ;;  %s359_s21 = scalar_lea.vmem %s4118_s10, %s2748_s15 }
 0x2c9   : > { %v3120_v54 = vpop.permute.xlu1 %982 }
 0x2cb   : > { %v3122_v55 = vpop.permute.xlu0 %1042  ;;  %1580 = vrot.lane.b32.xlu1 %v3010_v44, %s2845_s18 }
 0x2cd   : > { %v3126_v56 = vpop.permute.xlu1 %1038 }
 0x2cf   : > { %v3128_v57 = vpop.permute.xlu0 %1142  ;;  %1636 = vrot.lane.b32.xlu1 %v3010_v44, %s2846_s19 }
 0x2d1   : > { %v3132_v58 = vpop.permute.xlu1 %1138 }
 0x2d3   : > { %v3134_v59 = vpop.permute.xlu0 %1254  ;;  %1356 = vrot.lane.b32.xlu1 %v3015_v49, %s2851_s24 }
 0x2d5   : > { %v3138_v60 = vpop.permute.xlu1 %1194 }
 0x2d7   : > { %v3140_v61 = vpop.permute.xlu0 %1582  ;;  %1468 = vrot.lane.b32.xlu1 %v3015_v49, %s2854_s27 }
 0x2d8   : > { %4148 = vst [vmem:[#allocation3_spill] sm:$0xff] %v3140_v61 }
 0x2d9   : > { %v3144_v62 = vpop.permute.xlu1 %1250 }
 0x2db   : > { %v3146_v63 = vpop.permute.xlu0 %1638  ;;  %1308 = vrot.lane.b32.xlu1 %v3010_v44, %s2849_s22 }
 0x2dc   : > { %4149 = vst [vmem:[#allocation4_spill] sm:$0xff] %v3146_v63  ;;  %v4174_v63 = vrot.slane %v3231_v37, %v3221_v36 }
 0x2dd   : > { %v3150_v3 = vpop.permute.xlu1 %881 }
 0x2df   : > { %v3152_v4 = vpop.permute.xlu0 %1098  ;;  %1520 = vrot.lane.b32.xlu1 %v3010_v44, %s2850_s23 }
 0x2e0   : > { %4150 = vst [vmem:[#allocation5_spill] sm:$0xff] %v3152_v4 }
 0x2e1   : > { %v3156_v5 = vpop.permute.xlu1 %1094 }
 0x2e2   : > { %4151 = vst [vmem:[#allocation6_spill] sm:$0xff] %v3156_v5 }
 0x2e3   : > { %v3158_v6 = vpop.permute.xlu0 %1578  ;;  %1584 = vrot.lane.b32.xlu1 %v3015_v49, %s2845_s18 }
 0x2e4   : > { %4152 = vst [vmem:[#allocation7_spill] sm:$0xff] %v3158_v6 }
 0x2e5   : > { %v3162_v8 = vpop.permute.xlu1 %986 }
 0x2e7   : > { %v3172_v13 = vpop.permute.xlu0 %1306  ;;  %1736 = vrot.lane.b32.xlu1 %v3010_v44, %s2853_s26 }
 0x2e9   : > { %v3178_v16 = vpop.permute.xlu1 %1198 }
 0x2eb   : > { %v3182_v19 = vpop.permute.xlu0 %1518  ;;  %1740 = vrot.lane.b32.xlu1 %v3015_v49, %s2853_s26 }
 0x2ec   : > { %4157 = vst [vmem:[#allocation12_spill] sm:$0xff] %v3182_v19 }
 0x2ed   : > { %v3191_v22 = vpop.permute.xlu1 %1350 }
 0x2ee   : > { %4158 = vst [vmem:[#allocation13_spill] sm:$0xff] %v3191_v22 }
 0x2ef   : > { %v3193_v24 = vpop.permute.xlu0 %1410  ;;  %2185 = vperm.xlu1 %2801, %v2182_v20   ;;  %v3292_v20 = vld [vmem:[%s4117_s9 + $0x46] ss:$8 sm:$0xf] }
 0x2f1   : > { %v3197_v27 = vpop.permute.xlu1 %1406 }
 0x2f3   : > { %v3219_v35 = vpop.permute.xlu0 %1738 }
 0x2f4   : > { %4159 = vst [vmem:[#allocation14_spill] sm:$0xff] %v3219_v35 }
 0x2f5   : > { %v3238_v38 = vpop.permute.xlu1 %1462 }
 0x2f7   : > { %v3261_v44 = vpop.permute.xlu0 %1522 }
 0x2f8   : > { %4161 = vst [vmem:[#allocation16_spill] sm:$0xff] %v3261_v44 }
 0x2f9   : > { %v3299_v23 = vpop.permute.xlu1 %885 }
 0x2fb   : > { %v3333_v49 = vpop.permute.xlu0 %1690 }
 0x2fc   : > { %4162 = vst [vmem:[#allocation17_spill] sm:$0xff] %v3333_v49 }
 0x2fd   : > { %v3366_v47 = vpop.permute.xlu1 %1634 }
 0x2fe   : > { %4163 = vst [vmem:[#allocation18_spill] sm:$0xff] %v3366_v47  ;;  %v4173_v47 = vrot.slane %v3231_v37, %v3212_v33 }
 0x2ff   : > { %v1253_v39 = vpop.permute.xlu0 %1252 }
 0x300   : > { %v1260_v41 = vsel %vm1258_vm8, %v1253_v39, %v3134_v59  ;;  %v1261_v25 = vsel %vm1258_vm8, %v3144_v62, %v1253_v39  ;;  %v4167_v39 = vrot.slane %v3217_v34, %v3201_v29 }
 0x301   : > { %v1287_v7 = vmul.f32 %v4164_v42, %v1261_v25  ;;  %v1288_v12 = vmul.f32 %v4165_v2, %v1260_v41  ;;  %v2090_v9 = vmul.f32 %v4166_v18, %v1261_v25  ;;  %v3415_v26 = vpop.permute.xlu1 %1354 }
 0x302   : > { %v2091_v11 = vmul.f32 %v4167_v39, %v1260_v41  ;;  %4168 = vst [vmem:[#allocation19_spill] sm:$0xff] %v3415_v26  ;;  %v3433_v41 = vld [vmem:[%s4117_s9 + $0x62] ss:$8 sm:$0xf] }
 0x303   : > { %4170 = vst [vmem:[#allocation21_spill] sm:$0xff] %v3433_v41  ;;  %v3438_v39 = vld [vmem:[%s4117_s9 + $0x6] ss:$8 sm:$0xf]  ;;  %v1295_v42 = vrot.slane %v1287_v7, 2  ;;  %v1296_v35 = vrot.slane %v1288_v12, 2  ;;  %v989_v61 = vpop.permute.xlu0 %988 }
 0x304   : > { %v2098_v6 = vrot.slane %v2090_v9, 6  ;;  %v2099_v2 = vrot.slane %v2091_v11, 6  ;;  %v991_v18 = vsel %vm990_vm9, %v3162_v8, %v989_v61  ;;  %v994_v25 = vsel %vm990_vm9, %v989_v61, %v3120_v54  ;;  %v3453_v9 = vld [vmem:[%s4117_s9 + $0x60] ss:$8 sm:$0xf] }
 0x305   : > { %1303 = vst [vmem:[#allocation2 + $0x28] sm:$0xc0] %v1295_v42  ;;  %1304 = vst [vmem:[#allocation2 + $0x30] sm:$0xc0] %v1296_v35  ;;  %v4171_v11 = vrot.slane %v3226_v0, %v3210_v32  ;;  %v4172_v61 = vrot.slane %v3226_v0, %v3221_v36  ;;  %v1901_v49 = vmul.f32 %v4173_v47, %v991_v18  ;;  %v3467_v42 = vpop.permute.xlu1 %1466 }
 0x306   : > { %2106 = vst [vmem:[#allocation2 + $0xc0] sm:$0xc] %v2098_v6  ;;  %2107 = vst [vmem:[#allocation2 + $0xc8] sm:$0xc] %v2099_v2  ;;  %v1902_v19 = vmul.f32 %v4174_v63, %v994_v25  ;;  %v4176_v35 = vrot.slane %v3236_v1, %v3221_v36  ;;  %v4177_v63 = vrot.slane %v3246_v40, %v3212_v33 }
 0x307   : > { %v1018_v12 = vmul.f32 %v4171_v11, %v994_v25  ;;  %v1021_v7 = vmul.f32 %v4172_v61, %v991_v18  ;;  %v3473_v6 = vld [vmem:[%s4117_s9 + $0x24] ss:$8 sm:$0xf]  ;;  %1905 = vst [vmem:[#allocation2 + $0xb0] sm:$0x3] %v1901_v49  ;;  %v1145_v11 = vpop.permute.xlu0 %1144  ;;  %v4175_v49 = vrot.slane %v3236_v1, %v3210_v32 }
 0x308   : > { %1906 = vst [vmem:[#allocation2 + $0xb8] sm:$0x3] %v1902_v19  ;;  %v1147_v2 = vsel %vm1146_vm10, %v3128_v57, %v1145_v11  ;;  %v1150_v47 = vsel %vm1146_vm10, %v1145_v11, %v3132_v58 }
 0x309   : > { %v1026_v18 = vrot.slane %v1018_v12, 4  ;;  %v1029_v25 = vrot.slane %v1021_v7, 4  ;;  %v1174_v7 = vmul.f32 %v4175_v49, %v1150_v47  ;;  %v1177_v61 = vmul.f32 %v4176_v35, %v1147_v2  ;;  %v3509_v41 = vpop.permute.xlu1 %1310 }
 0x30a   : > { %v2018_v11 = vmul.f32 %v4177_v63, %v1147_v2  ;;  %v4178_v12 = vrot.slane %v3246_v40, %v3221_v36  ;;  %v4182_v2 = vrot.slane %v3217_v34, %v3221_v36 }
 0x30b   : > { %1034 = vst [vmem:[#allocation2] sm:$0x30] %v1026_v18  ;;  %1037 = vst [vmem:[#allocation2 + $0x18] sm:$0x30] %v1029_v25  ;;  %v1182_v63 = vrot.slane %v1174_v7, 6  ;;  %v1257_v48 = vpop.permute.xlu0 %1256 }
 0x30c   : > { %v2019_v44 = vmul.f32 %v4178_v12, %v1150_v47  ;;  %v3515_v18 = vld [vmem:[%s4117_s9 + $0x27] ss:$8 sm:$0xf]  ;;  %v1185_v12 = vrot.slane %v1177_v61, 6  ;;  %v2026_v49 = vrot.slane %v2018_v11, 2  ;;  %v1259_v35 = vsel %vm1258_vm8, %v3134_v59, %v1257_v48 }
 0x30d   : > { %v1262_v25 = vsel %vm1258_vm8, %v1257_v48, %v3144_v62  ;;  %1190 = vst [vmem:[#allocation2 + $0x20] sm:$0xc] %v1182_v63  ;;  %v4180_v59 = vrot.slane %v3206_v30, %v3221_v36  ;;  %v4181_v62 = vrot.slane %v3217_v34, %v3212_v33  ;;  %v3548_v63 = vpop.permute.xlu1 %1734  ;;  %v4193_v47 = vrot.slane %v3313_v15, %v3212_v33 }
 0x30e   : > { %v2027_v19 = vrot.slane %v2019_v44, 2  ;;  %1193 = vst [vmem:[#allocation2 + $0x38] sm:$0xc] %v1185_v12  ;;  %2034 = vst [vmem:[#allocation2 + $0xb0] sm:$0xc0] %v2026_v49  ;;  %v4179_v44 = vrot.slane %v3206_v30, %v3210_v32  ;;  %v2093_v7 = vmul.f32 %v4182_v2, %v1262_v25  ;;  %v4187_v12 = vrot.slane %v3274_v50, %v3201_v29 }
 0x30f   : > { %v1289_v11 = vmul.f32 %v4180_v59, %v1259_v35  ;;  %v2092_v48 = vmul.f32 %v4181_v62, %v1259_v35  ;;  %4183 = vst [vmem:[#allocation22_spill] sm:$0xff] %v3548_v63  ;;  %v884_v59 = vpop.permute.xlu0 %883  ;;  %vm1698_vm8 = vcmp.lt.s32.totalorder %v3199_v28, 120 }
 0x310   : > { %2035 = vst [vmem:[#allocation2 + $0xb8] sm:$0xc0] %v2027_v19  ;;  %v1286_v61 = vmul.f32 %v4179_v44, %v1262_v25  ;;  %v3554_v19 = vld [vmem:[%s4117_s9 + $0x40] ss:$8 sm:$0xf]  ;;  %v2101_v44 = vrot.slane %v2093_v7, 6  ;;  %v893_v62 = vsel %vm891_vm11, %v884_v59, %v3299_v23  ;;  %v894_v30 = vsel %vm891_vm11, %v3150_v3, %v884_v59 }
 0x311   : > { %v1297_v2 = vrot.slane %v1289_v11, 2  ;;  %v2100_v49 = vrot.slane %v2092_v48, 6  ;;  %v4184_v7 = vrot.slane %v3259_v43, %v3201_v29  ;;  %v4185_v11 = vrot.slane %v3259_v43, %v3212_v33 }
 0x312   : > { %v1294_v25 = vrot.slane %v1286_v61, 2  ;;  %2109 = vst [vmem:[#allocation2 + $0xd8] sm:$0xc] %v2101_v44  ;;  %v4186_v59 = vrot.slane %v3274_v50, %v3210_v32  ;;  %v1814_v35 = vmul.f32 %v4187_v12, %v893_v62 }
 0x313   : > { %1305 = vst [vmem:[#allocation2 + $0x38] sm:$0xc0] %v1297_v2  ;;  %2108 = vst [vmem:[#allocation2 + $0xd0] sm:$0xc] %v2100_v49  ;;  %v919_v61 = vmul.f32 %v4184_v7, %v894_v30  ;;  %v920_v48 = vmul.f32 %v4185_v11, %v893_v62  ;;  %v1097_v62 = vpop.permute.xlu0 %1096  ;;  %2528 = vadd.xlane.f32.xlu1 %v3208_v31 }
 0x314   : > { %1302 = vst [vmem:[#allocation2 + $0x20] sm:$0xc0] %v1294_v25  ;;  %v1813_v34 = vmul.f32 %v4186_v59, %v894_v30  ;;  %v3586_v25 = vpop.permute.xlu1 %1694  ;;  %v1822_v12 = vrot.slane %v1814_v35, 4  ;;  %v1104_v2 = vsel %vm1102_vm12, %v1097_v62, %v3152_v4  ;;  %v4189_v59 = vrot.slane %v3279_v51, %v3212_v33 }
 0x315   : > { %923 = vst [vmem:[#allocation2 + $0x8] sm:$0x3] %v919_v61  ;;  %924 = vst [vmem:[#allocation2 + $0x10] sm:$0x3] %v920_v48  ;;  %v4188_v48 = vrot.slane %v3279_v51, %v3201_v29  ;;  %v4190_v30 = vrot.slane %v3292_v20, %v3210_v32  ;;  %v4191_v35 = vrot.slane %v3292_v20, %v3201_v29 }
 0x316   : > { %v1821_v7 = vrot.slane %v1813_v34, 4  ;;  %v1105_v34 = vsel %vm1102_vm12, %v3156_v5, %v1097_v62  ;;  %1830 = vst [vmem:[#allocation2 + $0x88] sm:$0x30] %v1822_v12  ;;  %v1132_v11 = vmul.f32 %v4189_v59, %v1104_v2  ;;  %v4197_v59 = vrot.slane %v3297_v21, %v3212_v33 }
 0x317   : > { %v1131_v31 = vmul.f32 %v4188_v48, %v1105_v34  ;;  %v1973_v62 = vmul.f32 %v4190_v30, %v1105_v34  ;;  %v1974_v44 = vmul.f32 %v4191_v35, %v1104_v2  ;;  %v1353_v35 = vpop.permute.xlu0 %1352  ;;  %v4192_v48 = vrot.slane %v3313_v15, %v3201_v29 }
 0x318   : > { %1829 = vst [vmem:[#allocation2 + $0x80] sm:$0x30] %v1821_v7  ;;  %v929_v49 = vpop.permute.xlu1 %928  ;;  %1136 = vst [vmem:[#allocation2 + $0x30] sm:$0x3] %v1132_v11 }
 0x319   : > { %v936_v7 = vsel %vm934_vm13, %v929_v49, %v3116_v53  ;;  %v937_v12 = vsel %vm934_vm13, %v3114_v52, %v929_v49  ;;  %1135 = vst [vmem:[#allocation2 + $0x28] sm:$0x3] %v1131_v31  ;;  %v1981_v2 = vrot.slane %v1973_v62, 4  ;;  %v1982_v34 = vrot.slane %v1974_v44, 4 }
 0x31a   : > { %v963_v61 = vmul.f32 %v4192_v48, %v937_v12  ;;  %v964_v63 = vmul.f32 %v4193_v47, %v936_v7  ;;  %v1360_v49 = vsel %vm1358_vm14, %v1353_v35, %v3415_v26  ;;  %v1361_v31 = vsel %vm1358_vm14, %v3191_v22, %v1353_v35 }
 0x31b   : > { %v4194_v44 = vrot.slane %v3318_v14, %v3210_v32  ;;  %v4195_v62 = vrot.slane %v3318_v14, %v3201_v29  ;;  %1989 = vst [vmem:[#allocation2 + $0xa0] sm:$0x30] %v1981_v2  ;;  %1990 = vst [vmem:[#allocation2 + $0xa8] sm:$0x30] %v1982_v34  ;;  %v4196_v47 = vrot.slane %v3297_v21, %v3201_v29 }
 0x31c   : > { %v1388_v26 = vmul.f32 %v4197_v59, %v1360_v49  ;;  %v971_v5 = vrot.slane %v963_v61, 6  ;;  %v972_v35 = vrot.slane %v964_v63, 6  ;;  %v985_v22 = vpop.permute.xlu1 %984  ;;  %v4198_v61 = vrot.slane %v3226_v0, %v3201_v29 }
 0x31d   : > { %v1856_v11 = vmul.f32 %v4194_v44, %v937_v12  ;;  %v1857_v48 = vmul.f32 %v4195_v62, %v936_v7  ;;  %v1387_v30 = vmul.f32 %v4196_v47, %v1361_v31  ;;  %v992_v12 = vsel %vm990_vm9, %v985_v22, %v3162_v8  ;;  %v1409_v31 = vpop.permute.xlu0 %1408 }
 0x31e   : > { %v993_v7 = vsel %vm990_vm9, %v3120_v54, %v985_v22  ;;  %v1396_v34 = vrot.slane %v1388_v26, 6  ;;  %979 = vst [vmem:[#allocation2 + $0x8] sm:$0xc] %v971_v5  ;;  %980 = vst [vmem:[#allocation2 + $0x10] sm:$0xc] %v972_v35  ;;  %v4199_v59 = vrot.slane %v3226_v0, %v3212_v33  ;;  %v1416_v54 = vsel %vm1414_vm15, %v1409_v31, %v3193_v24 }
 0x31f   : > { %v1864_v4 = vrot.slane %v1856_v11, 2  ;;  %v1865_v43 = vrot.slane %v1857_v48, 2  ;;  %v1395_v2 = vrot.slane %v1387_v30, 6  ;;  %v1019_v63 = vmul.f32 %v4198_v61, %v993_v7 }
 0x320   : > { %v1020_v49 = vmul.f32 %v4199_v59, %v992_v12  ;;  %v1417_v5 = vsel %vm1414_vm15, %v3197_v27, %v1409_v31  ;;  %v4200_v8 = vrot.slane %v3231_v37, %v3210_v32  ;;  %v4201_v0 = vrot.slane %v3231_v37, %v3201_v29  ;;  %1404 = vst [vmem:[#allocation2 + $0x50] sm:$0xc] %v1396_v34  ;;  %v1041_v48 = vpop.permute.xlu1 %1040 }
 0x321   : > { %1872 = vst [vmem:[#allocation2 + $0x80] sm:$0xc0] %v1864_v4  ;;  %1873 = vst [vmem:[#allocation2 + $0x88] sm:$0xc0] %v1865_v43  ;;  %v4202_v4 = vrot.slane %v3331_v10, %v3201_v29  ;;  %v4203_v30 = vrot.slane %v3331_v10, %v3212_v33  ;;  %v1027_v11 = vrot.slane %v1019_v63, 4  ;;  %v1048_v37 = vsel %vm1046_vm1, %v1041_v48, %v3122_v55  ;;  %v1465_v34 = vpop.permute.xlu0 %1464 }
 0x322   : > { %v1899_v22 = vmul.f32 %v4200_v8, %v993_v7  ;;  %v1900_v26 = vmul.f32 %v4201_v0, %v992_v12  ;;  %1403 = vst [vmem:[#allocation2 + $0x48] sm:$0xc] %v1395_v2  ;;  %v1028_v62 = vrot.slane %v1020_v49, 4  ;;  %v1049_v47 = vsel %vm1046_vm1, %v3126_v56, %v1041_v48 }
 0x323   : > { %v1443_v43 = vmul.f32 %v4202_v4, %v1417_v5  ;;  %v1444_v44 = vmul.f32 %v4203_v30, %v1416_v54  ;;  %v1808_v35 = vrot.slane %v3274_v50, %v3221_v36  ;;  %v1113_v12 = vrot.slane %v3279_v51, %v3210_v32  ;;  %1035 = vst [vmem:[#allocation2 + $0x8] sm:$0x30] %v1027_v11 }
 0x324   : > { %1903 = vst [vmem:[#allocation2 + $0xa0] sm:$0x3] %v1899_v22  ;;  %1904 = vst [vmem:[#allocation2 + $0xa8] sm:$0x3] %v1900_v26  ;;  %v4204_v31 = vrot.slane %v3359_v45, %v3201_v29  ;;  %v4205_v63 = vrot.slane %v3359_v45, %v3212_v33  ;;  %v1472_v49 = vsel %vm1470_vm3, %v1465_v34, %v3467_v42  ;;  %vm1586_vm9 = vcmp.lt.s32.totalorder %v3199_v28, 127 }
 0x325   : > { %v1451_v7 = vrot.slane %v1443_v43, 4  ;;  %v1452_v2 = vrot.slane %v1444_v44, 4  ;;  %1036 = vst [vmem:[#allocation2 + $0x10] sm:$0x30] %v1028_v62  ;;  %v1473_v54 = vsel %vm1470_vm3, %v3238_v38, %v1465_v34  ;;  %v4206_v5 = vrot.slane %v3364_v46, %v3210_v32  ;;  %v1141_v62 = vpop.permute.xlu1 %1140 }
 0x326   : > { %v1075_v61 = vmul.f32 %v4204_v31, %v1049_v47  ;;  %v1076_v59 = vmul.f32 %v4205_v63, %v1048_v37  ;;  %v4207_v22 = vrot.slane %v3364_v46, %v3201_v29  ;;  %v4208_v26 = vrot.slane %v3346_v17, %v3201_v29  ;;  %v1413_v31 = vpop.permute.xlu0 %1412 }
 0x327   : > { %v1930_v8 = vmul.f32 %v4206_v5, %v1049_v47  ;;  %1459 = vst [vmem:[#allocation2 + $0x48] sm:$0x30] %v1451_v7  ;;  %1460 = vst [vmem:[#allocation2 + $0x50] sm:$0x30] %v1452_v2  ;;  %v4209_v43 = vrot.slane %v3346_v17, %v3212_v33  ;;  %v1149_v7 = vsel %vm1146_vm10, %v3132_v58, %v1141_v62 }
 0x328   : > { %v1931_v0 = vmul.f32 %v4207_v22, %v1048_v37  ;;  %v1499_v4 = vmul.f32 %v4208_v26, %v1473_v54  ;;  %v1083_v44 = vrot.slane %v1075_v61, 2  ;;  %v1084_v11 = vrot.slane %v1076_v59, 2 }
 0x329   : > { %v1500_v30 = vmul.f32 %v4209_v43, %v1472_v49  ;;  %v1938_v48 = vrot.slane %v1930_v8, 6  ;;  %v1148_v37 = vsel %vm1146_vm10, %v1141_v62, %v3128_v57  ;;  %v4210_v61 = vrot.slane %v3236_v1, %v3201_v29  ;;  %v1197_v43 = vpop.permute.xlu1 %1196 }
 0x32a   : > { %v1939_v47 = vrot.slane %v1931_v0, 6  ;;  %v1507_v2 = vrot.slane %v1499_v4, 2  ;;  %1091 = vst [vmem:[#allocation2 + $0x8] sm:$0xc0] %v1083_v44  ;;  %1092 = vst [vmem:[#allocation2 + $0x10] sm:$0xc0] %v1084_v11  ;;  %v4211_v59 = vrot.slane %v3236_v1, %v3212_v33  ;;  %v1415_v57 = vsel %vm1414_vm15, %v3193_v24, %v1413_v31 }
 0x32b   : > { %v1508_v34 = vrot.slane %v1500_v30, 2  ;;  %v1175_v63 = vmul.f32 %v4210_v61, %v1149_v7  ;;  %1946 = vst [vmem:[#allocation2 + $0xa0] sm:$0xc] %v1938_v48  ;;  %v1418_v58 = vsel %vm1414_vm15, %v1413_v31, %v3197_v27  ;;  %v4212_v54 = vrot.slane %v3246_v40, %v3210_v32 }
 0x32c   : > { %v1176_v49 = vmul.f32 %v4211_v59, %v1148_v37  ;;  %1947 = vst [vmem:[#allocation2 + $0xa8] sm:$0xc] %v1939_v47  ;;  %v4213_v8 = vrot.slane %v3246_v40, %v3201_v29  ;;  %1515 = vst [vmem:[#allocation2 + $0x48] sm:$0xc0] %v1507_v2  ;;  %v4214_v1 = vrot.slane %v3331_v10, %v3210_v32  ;;  %vm1742_vm10 = vcmp.lt.s32.totalorder %v3199_v28, 119 }
 0x32d   : > { %v2016_v5 = vmul.f32 %v4212_v54, %v1149_v7  ;;  %1516 = vst [vmem:[#allocation2 + $0x50] sm:$0xc0] %v1508_v34  ;;  %v4215_v24 = vrot.slane %v3331_v10, %v3221_v36  ;;  %v1183_v4 = vrot.slane %v1175_v63, 6  ;;  %v1204_v40 = vsel %vm1202_vm4, %v1197_v43, %v3178_v16  ;;  %v1313_v10 = vpop.permute.xlu0 %1312 }
 0x32e   : > { %v2017_v22 = vmul.f32 %v4213_v8, %v1148_v37  ;;  %v1442_v0 = vmul.f32 %v4214_v1, %v1418_v58  ;;  %v1184_v27 = vrot.slane %v1176_v49, 6  ;;  %v1205_v11 = vsel %vm1202_vm4, %v3138_v60, %v1197_v43 }
 0x32f   : > { %v1445_v26 = vmul.f32 %v4215_v24, %v1415_v57  ;;  %v2024_v30 = vrot.slane %v2016_v5, 2  ;;  %1191 = vst [vmem:[#allocation2 + $0x28] sm:$0xc] %v1183_v4  ;;  %v4216_v47 = vrot.slane %v3438_v39, %v3201_v29  ;;  %v4217_v7 = vrot.slane %v3438_v39, %v3212_v33  ;;  %v4220_v57 = vld [vmem:[#allocation20_spill] sm:$0xff]  ;;  %v933_v4 = vpop.permute.xlu1 %932 }
 0x330   : > { %v2025_v44 = vrot.slane %v2017_v22, 2  ;;  %v1450_v62 = vrot.slane %v1442_v0, 4  ;;  %1192 = vst [vmem:[#allocation2 + $0x30] sm:$0xc] %v1184_v27  ;;  %v1315_v34 = vsel %vm1314_vm5, %v3509_v41, %v1313_v10  ;;  %v1318_v31 = vsel %vm1314_vm5, %v1313_v10, %v3172_v13  ;;  %v4223_v22 = vld [vmem:[#allocation21_spill] sm:$0xff] }
 0x331   : > { %v1453_v48 = vrot.slane %v1445_v26, 4  ;;  %v1231_v37 = vmul.f32 %v4216_v47, %v1205_v11  ;;  %v1232_v2 = vmul.f32 %v4217_v7, %v1204_v40  ;;  %2032 = vst [vmem:[#allocation2 + $0xa0] sm:$0xc0] %v2024_v30  ;;  %v4218_v61 = vrot.slane %v3453_v9, %v3210_v32 }
 0x332   : > { %2033 = vst [vmem:[#allocation2 + $0xa8] sm:$0xc0] %v2025_v44  ;;  %v4219_v59 = vrot.slane %v3453_v9, %v3201_v29  ;;  %1458 = vst [vmem:[#allocation2 + $0x40] sm:$0x30] %v1450_v62  ;;  %v4221_v58 = vrot.slane %v4220_v57, %v3210_v32  ;;  %v4222_v5 = vrot.slane %v4220_v57, %v3221_v36  ;;  %v1525_v62 = vpop.permute.xlu0 %1524 }
 0x333   : > { %v2059_v63 = vmul.f32 %v4218_v61, %v1205_v11  ;;  %1461 = vst [vmem:[#allocation2 + $0x58] sm:$0x30] %v1453_v48  ;;  %v4224_v1 = vrot.slane %v4223_v22, %v3212_v33  ;;  %v4225_v24 = vrot.slane %v4223_v22, %v3221_v36  ;;  %v1239_v27 = vrot.slane %v1231_v37, 4 }
 0x334   : > { %v2060_v49 = vmul.f32 %v4219_v59, %v1204_v40  ;;  %v1342_v54 = vmul.f32 %v4221_v58, %v1318_v31  ;;  %v1345_v8 = vmul.f32 %v4222_v5, %v1315_v34  ;;  %v1240_v43 = vrot.slane %v1232_v2, 4 }
 0x335   : > { %v2135_v0 = vmul.f32 %v4224_v1, %v1315_v34  ;;  %v2136_v26 = vmul.f32 %v4225_v24, %v1318_v31  ;;  %2063 = vst [vmem:[#allocation2 + $0xc0] sm:$0x3] %v2059_v63  ;;  %v935_v30 = vsel %vm934_vm13, %v3116_v53, %v933_v4  ;;  %v938_v44 = vsel %vm934_vm13, %v933_v4, %v3114_v52  ;;  %v4228_v53 = vld [vmem:[#allocation16_spill] sm:$0xff] }
 0x336   : > { %2064 = vst [vmem:[#allocation2 + $0xc8] sm:$0x3] %v2060_v49  ;;  %1346 = vst [vmem:[#allocation2 + $0x40] sm:$0x3] %v1342_v54  ;;  %v4226_v48 = vrot.slane %v3313_v15, %v3210_v32  ;;  %v4227_v47 = vrot.slane %v3313_v15, %v3221_v36  ;;  %v1527_v7 = vsel %vm1526_vm6, %v4228_v53, %v1525_v62  ;;  %v4229_v52 = vld [vmem:[#allocation12_spill] sm:$0xff] }
 0x337   : > { %1349 = vst [vmem:[#allocation2 + $0x58] sm:$0x3] %v1345_v8  ;;  %v2143_v40 = vrot.slane %v2135_v0, 4  ;;  %v2144_v11 = vrot.slane %v2136_v26, 4  ;;  %1247 = vst [vmem:[#allocation2 + $0x28] sm:$0x30] %v1239_v27  ;;  %v1530_v2 = vsel %vm1526_vm6, %v1525_v62, %v4229_v52  ;;  %v4230_v34 = vrot.slane %v3318_v14, %v3212_v33  ;;  %v1045_v8 = vpop.permute.xlu1 %1044  ;;  %v1641_v26 = vpop.permute.xlu0 %1640 }
 0x338   : > { %v962_v10 = vmul.f32 %v4226_v48, %v938_v44  ;;  %v965_v37 = vmul.f32 %v4227_v47, %v935_v30  ;;  %1248 = vst [vmem:[#allocation2 + $0x30] sm:$0x30] %v1240_v43  ;;  %v4231_v61 = vrot.slane %v3318_v14, %v3221_v36  ;;  %v4232_v15 = vrot.slane %v3473_v6, %v3210_v32  ;;  %v4239_v48 = vld [vmem:[#allocation18_spill] sm:$0xff] }
 0x339   : > { %v1858_v31 = vmul.f32 %v4230_v34, %v935_v30  ;;  %2151 = vst [vmem:[#allocation2 + $0xd0] sm:$0x30] %v2143_v40  ;;  %2152 = vst [vmem:[#allocation2 + $0xd8] sm:$0x30] %v2144_v11  ;;  %v4233_v49 = vrot.slane %v3473_v6, %v3221_v36  ;;  %v1047_v14 = vsel %vm1046_vm1, %v3122_v55, %v1045_v8  ;;  %v4238_v11 = vld [vmem:[#allocation4_spill] sm:$0xff] }
 0x33a   : > { %v1859_v63 = vmul.f32 %v4231_v61, %v938_v44  ;;  %v1554_v59 = vmul.f32 %v4232_v15, %v1530_v2  ;;  %v970_v54 = vrot.slane %v962_v10, 6  ;;  %v973_v5 = vrot.slane %v965_v37, 6  ;;  %v2175_v28 = vld [vmem:[#allocation2 + $0xa8] sm:$0xff] }
 0x33b   : > { %v1557_v58 = vmul.f32 %v4233_v49, %v1527_v7  ;;  %v1866_v1 = vrot.slane %v1858_v31, 2  ;;  %v1050_v24 = vsel %vm1046_vm1, %v1045_v8, %v3126_v56  ;;  %v4234_v4 = vrot.slane %v3359_v45, %v3210_v32  ;;  %v1201_v61 = vpop.permute.xlu1 %1200 }
 0x33c   : > { %v1867_v0 = vrot.slane %v1859_v63, 2  ;;  %1558 = vst [vmem:[#allocation2 + $0x60] sm:$0x3] %v1554_v59  ;;  %978 = vst [vmem:[#allocation2] sm:$0xc] %v970_v54  ;;  %v4235_v43 = vrot.slane %v3359_v45, %v3221_v36  ;;  %v4236_v55 = vrot.slane %v3364_v46, %v3212_v33  ;;  %v4237_v56 = vrot.slane %v3364_v46, %v3221_v36 }
 0x33d   : > { %1561 = vst [vmem:[#allocation2 + $0x78] sm:$0x3] %v1557_v58  ;;  %981 = vst [vmem:[#allocation2 + $0x18] sm:$0xc] %v973_v5  ;;  %v1074_v27 = vmul.f32 %v4234_v4, %v1050_v24  ;;  %v1643_v62 = vsel %vm1642_vm7, %v4238_v11, %v1641_v26  ;;  %v1646_v10 = vsel %vm1642_vm7, %v1641_v26, %v4239_v48  ;;  %v1693_v5 = vpop.permute.xlu0 %1692 }
 0x33e   : > { %v1077_v30 = vmul.f32 %v4235_v43, %v1047_v14  ;;  %v1932_v44 = vmul.f32 %v4236_v55, %v1047_v14  ;;  %v1933_v40 = vmul.f32 %v4237_v56, %v1050_v24  ;;  %1874 = vst [vmem:[#allocation2 + $0x90] sm:$0xc0] %v1866_v1  ;;  %1875 = vst [vmem:[#allocation2 + $0x98] sm:$0xc0] %v1867_v0  ;;  %v2159_v24 = vld [vmem:[#allocation2 + $0x28] sm:$0xff] }
 0x33f   : > { %v1125_v45 = vrot.slane %v3279_v51, %v3221_v36  ;;  %v1964_v47 = vrot.slane %v3292_v20, %v3212_v33  ;;  %v4240_v46 = vrot.slane %v3515_v18, %v3212_v33  ;;  %v4241_v7 = vrot.slane %v3515_v18, %v3221_v36 }
 0x340   : > { %v1082_v34 = vrot.slane %v1074_v27, 2  ;;  %v1085_v31 = vrot.slane %v1077_v30, 2  ;;  %v1940_v63 = vrot.slane %v1932_v44, 6  ;;  %v1941_v15 = vrot.slane %v1933_v40, 6 }
 0x341   : > { %v1672_v37 = vmul.f32 %v4240_v46, %v1643_v62  ;;  %v1673_v2 = vmul.f32 %v4241_v7, %v1646_v10  ;;  %v1203_v59 = vsel %vm1202_vm4, %v3178_v16, %v1201_v61  ;;  %v1206_v49 = vsel %vm1202_vm4, %v1201_v61, %v3138_v60  ;;  %v4244_v16 = vld [vmem:[#allocation17_spill] sm:$0xff]  ;;  %v2155_v10 = vld [vmem:[#allocation2 + $0x8] sm:$0xff]  ;;  %v888_v46 = vpop.permute.xlu1 %887 }
 0x342   : > { %1090 = vst [vmem:[#allocation2] sm:$0xc0] %v1082_v34  ;;  %1093 = vst [vmem:[#allocation2 + $0x18] sm:$0xc0] %v1085_v31  ;;  %v4242_v8 = vrot.slane %v3438_v39, %v3210_v32  ;;  %v4243_v0 = vrot.slane %v3438_v39, %v3221_v36  ;;  %v1700_v60 = vsel %vm1698_vm8, %v1693_v5, %v3586_v25  ;;  %v1697_v34 = vpop.permute.xlu0 %1696  ;;  %v4249_v31 = vld [vmem:[#allocation15_spill] sm:$0xff] }
 0x343   : > { %v1680_v58 = vrot.slane %v1672_v37, 2  ;;  %v1681_v54 = vrot.slane %v1673_v2, 2  ;;  %1948 = vst [vmem:[#allocation2 + $0xb0] sm:$0xc] %v1940_v63  ;;  %1949 = vst [vmem:[#allocation2 + $0xb8] sm:$0xc] %v1941_v15  ;;  %v1701_v26 = vsel %vm1698_vm8, %v4244_v16, %v1693_v5  ;;  %v4245_v4 = vrot.slane %v3453_v9, %v3212_v33 }
 0x344   : > { %v1230_v1 = vmul.f32 %v4242_v8, %v1206_v49  ;;  %v1233_v14 = vmul.f32 %v4243_v0, %v1203_v59  ;;  %v4246_v43 = vrot.slane %v3453_v9, %v3221_v36  ;;  %v4247_v30 = vrot.slane %v3554_v19, %v3210_v32 }
 0x345   : > { %v2061_v27 = vmul.f32 %v4245_v4, %v1203_v59  ;;  %1688 = vst [vmem:[#allocation2 + $0x70] sm:$0xc0] %v1680_v58  ;;  %1689 = vst [vmem:[#allocation2 + $0x78] sm:$0xc0] %v1681_v54  ;;  %v4248_v44 = vrot.slane %v3554_v19, %v3201_v29  ;;  %v2750_v37 = vpack.c.bf16 %v2159_v24, %v2155_v10  ;;  %v4255_v24 = vld [vmem:[#allocation5_spill] sm:$0xff]  ;;  %v4258_v10 = vld [vmem:[#allocation7_spill] sm:$0xff] }
 0x346   : > { %v2062_v39 = vmul.f32 %v4246_v43, %v1206_v49  ;;  %v1726_v55 = vmul.f32 %v4247_v30, %v1701_v26  ;;  %v1238_v40 = vrot.slane %v1230_v1, 4  ;;  %v1241_v62 = vrot.slane %v1233_v14, 4  ;;  %v3912_v58 = vld [vmem:[%s4117_s9 + $0x26] ss:$8 sm:$0xf] }
 0x347   : > { %v1727_v56 = vmul.f32 %v4248_v44, %v1700_v60  ;;  %2065 = vst [vmem:[#allocation2 + $0xd0] sm:$0x3] %v2061_v27  ;;  %v892_v9 = vsel %vm891_vm11, %v3299_v23, %v888_v46  ;;  %v895_v7 = vsel %vm891_vm11, %v888_v46, %v3150_v3  ;;  %v1968_v2 = vrot.slane %v3292_v20, %v3221_v36 }
 0x348   : > { %2066 = vst [vmem:[#allocation2 + $0xd8] sm:$0x3] %v2062_v39  ;;  %1730 = vst [vmem:[#allocation2 + $0x80] sm:$0x3] %v1726_v55  ;;  %v4250_v61 = vrot.slane %v4249_v31, %v3210_v32  ;;  %v4251_v15 = vrot.slane %v4249_v31, %v3221_v36  ;;  %v4252_v59 = vrot.slane %v3274_v50, %v3212_v33  ;;  %2751 = vmatprep.subr.bf16.mxu0 %v2750_v37  ;;  %vm2188_vm11 = vcmask 441344  }
 0x349   : > { %1731 = vst [vmem:[#allocation2 + $0x88] sm:$0x3] %v1727_v56  ;;  %1246 = vst [vmem:[#allocation2 + $0x20] sm:$0x30] %v1238_v40  ;;  %v1816_v49 = vmul.f32 %v1808_v35, %v895_v7  ;;  %v1699_v54 = vsel %vm1698_vm8, %v3586_v25, %v1697_v34  ;;  %v1702_v5 = vsel %vm1698_vm8, %v1697_v34, %v4244_v16  ;;  %v1101_v25 = vpop.permute.xlu1 %1100  ;;  %v4256_v16 = vld [vmem:[#allocation6_spill] sm:$0xff]  ;;  %v4257_v40 = vld [vmem:[#allocation3_spill] sm:$0xff] }
 0x34a   : > { %1249 = vst [vmem:[#allocation2 + $0x38] sm:$0x30] %v1241_v62  ;;  %v918_v63 = vmul.f32 %v4250_v61, %v895_v7  ;;  %v921_v23 = vmul.f32 %v4251_v15, %v892_v9  ;;  %v1815_v3 = vmul.f32 %v4252_v59, %v892_v9  ;;  %v4253_v50 = vrot.slane %v3554_v19, %v3212_v33  ;;  %v2160_v15 = vld [vmem:[#allocation2 + $0x30] sm:$0xff] }
 0x34b   : > { %v4254_v8 = vrot.slane %v3554_v19, %v3221_v36  ;;  %v1824_v14 = vrot.slane %v1816_v49, 4  ;;  %v1103_v60 = vsel %vm1102_vm12, %v4255_v24, %v1101_v25  ;;  %v1106_v26 = vsel %vm1102_vm12, %v1101_v25, %v4256_v16 }
 0x34c   : > { %v1728_v35 = vmul.f32 %v4253_v50, %v1699_v54  ;;  %922 = vst [vmem:[#allocation2] sm:$0x3] %v918_v63  ;;  %925 = vst [vmem:[#allocation2 + $0x18] sm:$0x3] %v921_v23  ;;  %v1823_v0 = vrot.slane %v1815_v3, 4  ;;  %v1597_v4 = vrot.slane %v3912_v58, %v3210_v32  ;;  %v1601_v19 = vrot.slane %v3912_v58, %v3201_v29  ;;  %v2156_v50 = vld [vmem:[#allocation2 + $0x10] sm:$0xff] }
 0x34d   : > { %v1729_v1 = vmul.f32 %v4254_v8, %v1702_v5  ;;  %1832 = vst [vmem:[#allocation2 + $0x98] sm:$0x30] %v1824_v14  ;;  %v1130_v27 = vmul.f32 %v1113_v12, %v1106_v26  ;;  %v1133_v43 = vmul.f32 %v1125_v45, %v1103_v60  ;;  %v1975_v39 = vmul.f32 %v1964_v47, %v1103_v60  ;;  %v1581_v56 = vpop.permute.xlu1 %1580 }
 0x34e   : > { %1732 = vst [vmem:[#allocation2 + $0x90] sm:$0x3] %v1728_v35  ;;  %1831 = vst [vmem:[#allocation2 + $0x90] sm:$0x30] %v1823_v0  ;;  %v1976_v30 = vmul.f32 %v1968_v2, %v1106_v26  ;;  %v1588_v62 = vsel %vm1586_vm9, %v1581_v56, %v4257_v40  ;;  %v1589_v12 = vsel %vm1586_vm9, %v4258_v10, %v1581_v56  ;;  %v4259_v35 = vld [vmem:[#allocation19_spill] sm:$0xff]  ;;  %vm2347_vm12 = vcmask 15360  }
 0x34f   : > { %1733 = vst [vmem:[#allocation2 + $0x98] sm:$0x3] %v1729_v1  ;;  %1134 = vst [vmem:[#allocation2 + $0x20] sm:$0x3] %v1130_v27  ;;  %v1983_v55 = vrot.slane %v1975_v39, 4  ;;  %v1614_v51 = vmul.f32 %v1597_v4, %v1589_v12  ;;  %v1615_v45 = vmul.f32 %v1601_v19, %v1588_v62  ;;  %v1653_v20 = vrot.slane %v3515_v18, %v3210_v32  ;;  %v4260_v1 = vld [vmem:[#allocation13_spill] sm:$0xff] }
 0x350   : > { %1137 = vst [vmem:[#allocation2 + $0x38] sm:$0x3] %v1133_v43  ;;  %v1984_v44 = vrot.slane %v1976_v30, 4  ;;  %v1657_v47 = vrot.slane %v3515_v18, %v3201_v29  ;;  %v1369_v61 = vrot.slane %v3297_v21, %v3210_v32  ;;  %v1381_v18 = vrot.slane %v3297_v21, %v3221_v36 }
 0x351   : > { %1991 = vst [vmem:[#allocation2 + $0xb0] sm:$0x30] %v1983_v55  ;;  %v1622_v46 = vrot.slane %v1614_v51, 4  ;;  %v1623_v37 = vrot.slane %v1615_v45, 4  ;;  %v1637_v9 = vpop.permute.xlu1 %1636  ;;  %v2764_v21 = vpack.c.bf16 %v2160_v15, %v2156_v50  ;;  %v1481_v14 = vrot.slane %v3346_v17, %v3210_v32 }
 0x352   : > { %1992 = vst [vmem:[#allocation2 + $0xb8] sm:$0x30] %v1984_v44  ;;  %v1644_v7 = vsel %vm1642_vm7, %v1637_v9, %v4238_v11  ;;  %v1645_v2 = vsel %vm1642_vm7, %v4239_v48, %v1637_v9  ;;  %v1493_v60 = vrot.slane %v3346_v17, %v3221_v36  ;;  %v1329_v43 = vrot.slane %v4220_v57, %v3201_v29 }
 0x353   : > { %1630 = vst [vmem:[#allocation2 + $0x60] sm:$0x30] %v1622_v46  ;;  %1631 = vst [vmem:[#allocation2 + $0x68] sm:$0x30] %v1623_v37  ;;  %v1670_v34 = vmul.f32 %v1653_v20, %v1645_v2  ;;  %v1671_v31 = vmul.f32 %v1657_v47, %v1644_v7  ;;  %v2154_v63 = vld [vmem:[#allocation2] sm:$0xff]  ;;  %v2157_v59 = vld [vmem:[#allocation2 + $0x18] sm:$0xff]  ;;  %v1333_v39 = vrot.slane %v4220_v57, %v3212_v33 }
 0x354   : > { %v2116_v55 = vrot.slane %v4223_v22, %v3210_v32  ;;  %v1541_v12 = vrot.slane %v3473_v6, %v3201_v29  ;;  %v1545_v51 = vrot.slane %v3473_v6, %v3212_v33  ;;  %v1605_v2 = vrot.slane %v3912_v58, %v3212_v33 }
 0x355   : > { %v1678_v11 = vrot.slane %v1670_v34, 2  ;;  %v1679_v49 = vrot.slane %v1671_v31, 2  ;;  %v1357_v54 = vpop.permute.xlu1 %1356  ;;  %v1609_v34 = vrot.slane %v3912_v58, %v3221_v36  ;;  %v2724_v31 = vld [vmem:[%s4117_s9 + $0x41] ss:$8 sm:$0xf] }
 0x356   : > { %v2158_v23 = vld [vmem:[#allocation2 + $0x20] sm:$0xff]  ;;  %v1359_v8 = vsel %vm1358_vm14, %v4259_v35, %v1357_v54  ;;  %v1362_v0 = vsel %vm1358_vm14, %v1357_v54, %v4260_v1  ;;  %v1753_v58 = vrot.slane %v2724_v31, %v3210_v32  ;;  %v1757_v15 = vrot.slane %v2724_v31, %v3201_v29 }
 0x357   : > { %v2161_v3 = vld [vmem:[#allocation2 + $0x38] sm:$0xff]  ;;  %v2752_v5 = vpack.c.bf16 %v2158_v23, %v2154_v63  ;;  %1686 = vst [vmem:[#allocation2 + $0x60] sm:$0xc0] %v1678_v11  ;;  %1687 = vst [vmem:[#allocation2 + $0x68] sm:$0xc0] %v1679_v49  ;;  %v1386_v25 = vmul.f32 %v1369_v61, %v1362_v0  ;;  %v1389_v24 = vmul.f32 %v1381_v18, %v1359_v8 }
 0x358   : > { %v2762_v48 = vpack.c.bf16 %v2161_v3, %v2157_v59  ;;  %v4261_v11 = vld [vmem:[#allocation14_spill] sm:$0xff]  ;;  %v1765_v32 = vrot.slane %v2724_v31, %v3221_v36 }
 0x359   : > { %2753 = vmatpush1.bf16.msra.mxu0 %v2752_v5  ;;  %v1394_v16 = vrot.slane %v1386_v25, 6  ;;  %v1397_v26 = vrot.slane %v1389_v24, 6  ;;  %v1469_v4 = vpop.permute.xlu1 %1468 }
 0x35a   : > { %2763 = vmatprep.subr.bf16.mxu1 %v2762_v48  ;;  %v1471_v19 = vsel %vm1470_vm3, %v3467_v42, %v1469_v4  ;;  %v1474_v27 = vsel %vm1470_vm3, %v1469_v4, %v3238_v38  ;;  %v2120_v42 = vrot.slane %v4223_v22, %v3201_v29  ;;  %v1761_v48 = vrot.slane %v2724_v31, %v3212_v33 }
 0x35b   : > { %2765 = vmatpush1.bf16.msra.mxu1 %v2764_v21  ;;  %1402 = vst [vmem:[#allocation2 + $0x40] sm:$0xc] %v1394_v16  ;;  %1405 = vst [vmem:[#allocation2 + $0x58] sm:$0xc] %v1397_v26  ;;  %v1498_v17 = vmul.f32 %v1481_v14, %v1474_v27  ;;  %v1501_v30 = vmul.f32 %v1493_v60, %v1471_v19 }
 0x35d   : > { %v1506_v44 = vrot.slane %v1498_v17, 2  ;;  %v1509_v56 = vrot.slane %v1501_v30, 2  ;;  %v1309_v62 = vpop.permute.xlu1 %1308 }
 0x35e   : > { %v1316_v38 = vsel %vm1314_vm5, %v1309_v62, %v3509_v41  ;;  %v1317_v57 = vsel %vm1314_vm5, %v3172_v13, %v1309_v62  ;;  %v2166_v14 = vld [vmem:[#allocation2 + $0x60] sm:$0xff]  ;;  %v2177_v62 = vld [vmem:[#allocation2 + $0xb8] sm:$0xff] }
 0x35f   : > { %1514 = vst [vmem:[#allocation2 + $0x40] sm:$0xc0] %v1506_v44  ;;  %1517 = vst [vmem:[#allocation2 + $0x58] sm:$0xc0] %v1509_v56  ;;  %v1343_v22 = vmul.f32 %v1329_v43, %v1317_v57  ;;  %v1344_v45 = vmul.f32 %v1333_v39, %v1316_v38  ;;  %v2133_v20 = vmul.f32 %v2116_v55, %v1317_v57 }
 0x360   : > { %v2134_v47 = vmul.f32 %v2120_v42, %v1316_v38  ;;  %v2174_v42 = vld [vmem:[#allocation2 + $0xa0] sm:$0xff]  ;;  %v2176_v38 = vld [vmem:[#allocation2 + $0xb0] sm:$0xff] }
 0x361   : > { %1347 = vst [vmem:[#allocation2 + $0x48] sm:$0x3] %v1343_v22  ;;  %1348 = vst [vmem:[#allocation2 + $0x50] sm:$0x3] %v1344_v45  ;;  %v2141_v46 = vrot.slane %v2133_v20, 4  ;;  %v1521_v37 = vpop.permute.xlu1 %1520  ;;  %v2153_v20 = vld [vmem:[%s4114_s6] sm:$0xff] }
 0x362   : > { %v2142_v41 = vrot.slane %v2134_v47, 4  ;;  %v1528_v13 = vsel %vm1526_vm6, %v1521_v37, %v4228_v53  ;;  %v1529_v9 = vsel %vm1526_vm6, %v4229_v52, %v1521_v37  ;;  %v4264_v37 = vmov 0.0  }
 0x363   : > { %2149 = vst [vmem:[#allocation2 + $0xc0] sm:$0x30] %v2141_v46  ;;  %v1555_v6 = vmul.f32 %v1541_v12, %v1529_v9  ;;  %v1556_v7 = vmul.f32 %v1545_v51, %v1528_v13  ;;  %v2181_v46 = vld [vmem:[#allocation2 + $0xd8] sm:$0x3f]  ;;  %v4265_v13 = vld [vmem:[#allocation8_spill] sm:$0xff] }
 0x364   : > { %2150 = vst [vmem:[#allocation2 + $0xc8] sm:$0x30] %v2142_v41  ;;  %v4263_v41 = vld [vmem:[#allocation9_spill] sm:$0xff] }
 0x365   : > { %1559 = vst [vmem:[#allocation2 + $0x68] sm:$0x3] %v1555_v6  ;;  %1560 = vst [vmem:[#allocation2 + $0x70] sm:$0x3] %v1556_v7  ;;  %v1585_v53 = vpop.permute.xlu1 %1584  ;;  %v2180_v9 = vld [vmem:[#allocation2 + $0xd0] sm:$0x3f] }
 0x366   : > { %v1587_v52 = vsel %vm1586_vm9, %v4257_v40, %v1585_v53  ;;  %v1590_v61 = vsel %vm1586_vm9, %v1585_v53, %v4258_v10  ;;  %v4262_v40 = vld [vmem:[#allocation22_spill] sm:$0xff]  ;;  %v2162_v29 = vld [vmem:[#allocation2 + $0x40] sm:$0xff] }
 0x367   : > { %v1616_v18 = vmul.f32 %v1605_v2, %v1587_v52  ;;  %v1617_v63 = vmul.f32 %v1609_v34, %v1590_v61  ;;  %v2756_v60 = vpack.c.bf16 %v2166_v14, %v2162_v29  ;;  %v2165_v4 = vld [vmem:[#allocation2 + $0x58] sm:$0xff]  ;;  %v2346_v6 = vld [vmem:[%s4116_s8] sm:$0x3f] }
 0x368   : > { %v2163_v50 = vld [vmem:[#allocation2 + $0x48] sm:$0xff]  ;;  %v2164_v27 = vld [vmem:[#allocation2 + $0x50] sm:$0xff]  ;;  %v4266_v7 = vld [vmem:[#allocation11_spill] sm:$0xff] }
 0x369   : > { %v1624_v23 = vrot.slane %v1616_v18, 4  ;;  %v1625_v59 = vrot.slane %v1617_v63, 4  ;;  %v1737_v3 = vpop.permute.xlu1 %1736  ;;  %v4267_v2 = vld [vmem:[#allocation10_spill] sm:$0xff] }
 0x36a   : > { %v1744_v49 = vsel %vm1742_vm10, %v1737_v3, %v4261_v11  ;;  %v1745_v54 = vsel %vm1742_vm10, %v4262_v40, %v1737_v3  ;;  %v2178_v47 = vld [vmem:[#allocation2 + $0xc0] sm:$0x3f] }
 0x36b   : > { %1632 = vst [vmem:[#allocation2 + $0x70] sm:$0x30] %v1624_v23  ;;  %1633 = vst [vmem:[#allocation2 + $0x78] sm:$0x30] %v1625_v59  ;;  %v1770_v10 = vmul.f32 %v1753_v58, %v1745_v54  ;;  %v1771_v5 = vmul.f32 %v1757_v15, %v1744_v49  ;;  %v2179_v57 = vld [vmem:[#allocation2 + $0xc8] sm:$0x3f] }
 0x36c   : > { %v2167_v35 = vld [vmem:[#allocation2 + $0x68] sm:$0xff] }
 0x36d   : > { %v1778_v8 = vrot.slane %v1770_v10, 6  ;;  %v1779_v1 = vrot.slane %v1771_v5, 6  ;;  %v1741_v0 = vpop.permute.xlu1 %1740  ;;  %v2754_v21 = vpack.c.bf16 %v2167_v35, %v2163_v50 }
 0x36e   : > { %v1743_v25 = vsel %vm1742_vm10, %v4261_v11, %v1741_v0  ;;  %v1746_v24 = vsel %vm1742_vm10, %v1741_v0, %v4262_v40 }
 0x36f   : > { %1786 = vst [vmem:[#allocation2 + $0x80] sm:$0xc] %v1778_v8  ;;  %1787 = vst [vmem:[#allocation2 + $0x88] sm:$0xc] %v1779_v1  ;;  %v1772_v33 = vmul.f32 %v1761_v48, %v1743_v25  ;;  %v1773_v36 = vmul.f32 %v1765_v32, %v1746_v24  ;;  %2755 = vmatprep.subr.bf16.mxu0 %v2754_v21 }
 0x370   : > { %2757 = vmatpush1.bf16.msra.mxu0 %v2756_v60 }
 0x371   : > { %v1780_v16 = vrot.slane %v1772_v33, 6  ;;  %v1781_v26 = vrot.slane %v1773_v36, 6  ;;  %v2186_v53 = vpop.permute.xlu1 %2185 }
 0x372   : > { %v2169_v19 = vld [vmem:[#allocation2 + $0x78] sm:$0xff]  ;;  %v2168_v43 = vld [vmem:[#allocation2 + $0x70] sm:$0xff] }
 0x373   : > { %1788 = vst [vmem:[#allocation2 + $0x90] sm:$0xc] %v1780_v16  ;;  %1789 = vst [vmem:[#allocation2 + $0x98] sm:$0xc] %v1781_v26  ;;  %v2766_v39 = vpack.c.bf16 %v2169_v19, %v2165_v4  ;;  %v2768_v17 = vpack.c.bf16 %v2168_v43, %v2164_v27 }
 0x375   : > { %2767 = vmatprep.subr.bf16.mxu1 %v2766_v39 }
 0x376   : > { %2769 = vmatpush1.bf16.msra.mxu1 %v2768_v17  ;;  %v2171_v30 = vld [vmem:[#allocation2 + $0x88] sm:$0xff]  ;;  %v2170_v55 = vld [vmem:[#allocation2 + $0x80] sm:$0xff] }
 0x377   : > { %v2758_v44 = vpack.c.bf16 %v2175_v28, %v2171_v30  ;;  %v2760_v56 = vpack.c.bf16 %v2174_v42, %v2170_v55 }
 0x379   : > { %2759 = vmatprep.subr.bf16.mxu0 %v2758_v44 }
 0x37a   : > { %2761 = vmatpush1.bf16.msra.mxu0 %v2760_v56  ;;  %v2173_v12 = vld [vmem:[#allocation2 + $0x98] sm:$0xff]  ;;  %v2172_v51 = vld [vmem:[#allocation2 + $0x90] sm:$0xff] }
 0x37b   : > { %2734 = vmatprep.subr.msk.mxu0 %vm423_vm2, %v2179_v57  ;;  %v2770_v22 = vpack.c.bf16 %v2177_v62, %v2173_v12  ;;  %v2772_v45 = vpack.c.bf16 %v2176_v38, %v2172_v51 }
 0x37d   : > { %2771 = vmatprep.subr.bf16.mxu1 %v2770_v22 }
 0x37e   : > { %2773 = vmatpush1.bf16.msra.mxu1 %v2772_v45  ;;  %2735 = vmatpush1.msk.msra.mxu0 %vm423_vm2, %v2178_v47 }
 0x37f   : > { %2736 = vmatmul.mubr.msk.f32.vlgmr.msra.gmra.mrb[4].mxu0 %vm2188_vm11, %v2153_v20  ;;  %2737 = vmatprep.subr.msk.mxu1 %vm423_vm2, %v2181_v46 }
 0x380   : > { %2740 = vmatprep.subr.msk.mxu0 %vm380_vm0, %v4263_v41  ;;  %2427 = vmatprep.mubr.f32.mxu0 %v4264_v37 }
 0x381   : > { %2741 = vmatpush1.msk.msra.mxu0 %vm380_vm0, %v4265_v13 }
 0x382   : > { %2738 = vmatpush1.msk.msra.mxu1 %vm423_vm2, %v2180_v9 }
 0x383   : > { %2739 = vmatmul.mubr.msk.f32.vlgmr.msra.gmra.mrb[4].mxu1 %vm2188_vm11, %v2153_v20  ;;  %2743 = vmatprep.subr.msk.mxu1 %vm380_vm0, %v4266_v7 }
 0x384   : > { %2742 = vmatmul.mubr.msk.f32.vlgmr.msra.gmra.mrb[6].mxu0 %vm2347_vm12, %v2346_v6  ;;  %2744 = vmatpush1.msk.msra.mxu1 %vm380_vm0, %v4267_v2 }
 0x385   : > { %2498 = vmatprep.mubr.f32.mxu1 %v4264_v37 }
 0x387   : > { %2745 = vmatmul.mubr.msk.f32.vlgmr.msra.gmra.mrb[6].mxu1 %vm2347_vm12, %v2346_v6 }
 0x3a0   : > { %v2529_v8 = vpop.xlane.xlu1 %2528 }
 0x3a1   : > { %v2530_v1 = vmul.f32 0.001953125, %v2529_v8 }
 0x3a3   : > { %v2544_v0 = vsel %vm380_vm0, %v2530_v1, -inf }
 0x3a4   : > { %v2545_v21 = vrot.slane %v2544_v0, 4 }
 0x3a6   : > { %v2546_v14 = vmax.f32 %v2544_v0, %v2545_v21 }
 0x3a8   : > { %v2547_v60 = vrot.slane %v2546_v14, 2 }
 0x3aa   : > { %v2548_v4 = vmax.f32 %v2546_v14, %v2547_v60 }
 0x3ac   : > { %v2549_v17 = vrot.slane %v2548_v4, 1 }
 0x3ae   : > { %v2550_v44 = vmax.f32 %v2548_v4, %v2549_v17 }
 0x452   : > { %v2270_v34 = vpop.f32.mrb[4].mxu0 }
 0x453   : > { %v2272_v31 = vpop.f32.mrb[5].mxu0  ;;  %v4056_v52 = vadd.f32 %v2270_v34, %v2186_v53 }
 0x454   : > { %v4058_v61 = vadd.f32 %v2272_v31, %v2186_v53 }
 0x456   : > { %v2341_v18 = vpop.f32.mrb[4].mxu1  ;;  %v2505_v3 = vadd.f32 %v4058_v61, %v4056_v52 }
 0x457   : > { %v2343_v63 = vpop.f32.mrb[5].mxu1  ;;  %v4060_v58 = vpop.f32.mrb[6].mxu0  ;;  %v4070_v11 = vadd.f32 %v2341_v18, %v2186_v53 }
 0x458   : > { %v2511_v15 = vsel %vm423_vm2, %v4060_v58, 0.0  ;;  %v4064_v23 = vpop.f32.mrb[7].mxu0  ;;  %v4081_v29 = vadd.f32 %v2343_v63, %v2186_v53 }
 0x459   : > { %v2512_v59 = vsel %vm423_vm2, %v4064_v23, 0.0  ;;  %v2506_v32 = vadd.f32 %v2505_v3, %v4070_v11 }
 0x45a   : > { %v2513_v49 = vadd.f32 %v2512_v59, %v2511_v15  ;;  %v4072_v40 = vpop.f32.mrb[6].mxu1 }
 0x45b   : > { %v2514_v54 = vsel %vm423_vm2, %v4072_v40, 0.0  ;;  %v4076_v10 = vpop.f32.mrb[7].mxu1  ;;  %v2507_v35 = vadd.f32 %v2506_v32, %v4081_v29 }
 0x45c   : > { %v2515_v5 = vadd.f32 %v2514_v54, %v2513_v49  ;;  %v2516_v48 = vsel %vm423_vm2, %v4076_v10, 0.0 }
 0x45e   : > { %v2517_v50 = vadd.f32 %v2516_v48, %v2515_v5 }
 0x460   : > { %2518 = vadd.xlane.f32.xlu0 %v2517_v50 }
 0x464   : > { %2508 = vadd.xlane.f32.xlu0 %v2507_v35 }
 0x4ed   : > { %v2519_v25 = vpop.xlane.xlu0 %2518 }
 0x4ee   : > { %v2520_v24 = vmul.f32 0.001953125, %v2519_v25 }
 0x4f0   : > { %v2537_v33 = vsel %vm423_vm2, %v2520_v24, -inf }
 0x4f1   : > { %v2538_v36 = vrot.slane %v2537_v33, 4  ;;  %v2509_v16 = vpop.xlane.xlu0 %2508 }
 0x4f2   : > { %v2510_v26 = vmul.f32 0.001953125, %v2509_v16 }
 0x4f3   : > { %v2539_v19 = vmax.f32 %v2537_v33, %v2538_v36 }
 0x4f4   : > { %v2531_v27 = vrot.slane %v2510_v26, 4 }
 0x4f5   : > { %v2540_v43 = vrot.slane %v2539_v19, 2 }
 0x4f6   : > { %v2532_v39 = vmax.f32 %v2510_v26, %v2531_v27 }
 0x4f7   : > { %v2541_v28 = vmax.f32 %v2539_v19, %v2540_v43 }
 0x4f8   : > { %v2533_v30 = vrot.slane %v2532_v39, 2 }
 0x4f9   : > { %v2542_v55 = vrot.slane %v2541_v28, 1 }
 0x4fa   : > { %v2534_v42 = vmax.f32 %v2532_v39, %v2533_v30 }
 0x4fb   : > { %v2543_v56 = vmax.f32 %v2541_v28, %v2542_v55 }
 0x4fc   : > { %v2535_v62 = vrot.slane %v2534_v42, 1 }
 0x4fd   : > { %v2551_v38 = vmax.f32 %v2543_v56, %v2550_v44 }
 0x4fe   : > { %v2536_v57 = vmax.f32 %v2534_v42, %v2535_v62 }
 0x500   : > { %v2552_v12 = vmax.f32 %v2536_v57, %v2551_v38 }
 0x502   : > { %v2553_v51 = vsub.f32 %v2510_v26, %v2552_v12  ;;  %v2556_v22 = vsub.f32 %v2520_v24, %v2552_v12  ;;  %v2559_v45 = vsub.f32 %v2530_v1, %v2552_v12 }
 0x504   : > { %v2554_v20 = vmul.f32 1.442695, %v2553_v51  ;;  %v2557_v47 = vmul.f32 1.442695, %v2556_v22  ;;  %v2560_v46 = vmul.f32 1.442695, %v2559_v45 }
 0x506   : > { %2821 = vpow2.f32 %v2554_v20 }
 0x507   : > { %2823 = vpow2.f32 %v2557_v47 }
 0x508   : > { %2825 = vpow2.f32 %v2560_v46 }
 0x510   : > { %v2822_v37 = vpop.eup %2821 }
 0x511   : > { %v2824_v9 = vpop.eup %2823  ;;  %v2562_v6 = vrot.slane %v2822_v37, 4 }
 0x512   : > { %v2826_v34 = vpop.eup %2825  ;;  %v2568_v31 = vsel %vm423_vm2, %v2824_v9, 0.0 }
 0x513   : > { %v2563_v53 = vadd.f32 %v2822_v37, %v2562_v6  ;;  %v2569_v18 = vrot.slane %v2568_v31, 4  ;;  %v2576_v63 = vsel %vm380_vm0, %v2826_v34, 0.0 }
 0x514   : > { %v2577_v15 = vrot.slane %v2576_v63, 4 }
 0x515   : > { %v2564_v59 = vrot.slane %v2563_v53, 2  ;;  %v2570_v3 = vadd.f32 %v2569_v18, %v2568_v31 }
 0x516   : > { %v2578_v49 = vadd.f32 %v2577_v15, %v2576_v63 }
 0x517   : > { %v2565_v54 = vadd.f32 %v2564_v59, %v2563_v53  ;;  %v2571_v5 = vrot.slane %v2570_v3, 2 }
 0x518   : > { %v2579_v48 = vrot.slane %v2578_v49, 2 }
 0x519   : > { %v2566_v32 = vrot.slane %v2565_v54, 1  ;;  %v2572_v50 = vadd.f32 %v2571_v5, %v2570_v3 }
 0x51a   : > { %v2580_v35 = vadd.f32 %v2579_v48, %v2578_v49 }
 0x51b   : > { %v2567_v8 = vadd.f32 %v2566_v32, %v2565_v54  ;;  %v2573_v1 = vrot.slane %v2572_v50, 1 }
 0x51c   : > { %v2581_v0 = vrot.slane %v2580_v35, 1 }
 0x51d   : > { %v2574_v21 = vadd.f32 %v2573_v1, %v2572_v50 }
 0x51e   : > { %v2582_v25 = vadd.f32 %v2581_v0, %v2580_v35 }
 0x51f   : > { %v2575_v14 = vadd.f32 %v2574_v21, %v2567_v8 }
 0x521   : > { %v2583_v24 = vadd.f32 %v2582_v25, %v2575_v14 }
 0x523   : > { %2827 = vrcp.f32 %v2583_v24 }
 0x52d   : > { %v2828_v60 = vpop.eup %2827 }
 0x52e   : > { %v2586_v33 = vmul.f32 %v2828_v60, %v2822_v37  ;;  %v2587_v36 = vmul.f32 %v2828_v60, %v2824_v9  ;;  %v2588_v16 = vmul.f32 %v2828_v60, %v2826_v34 }
 0x530   : > { %v2589_v26 = vmul.f32 %v2586_v33, %v4056_v52  ;;  %v2590_v4 = vmul.f32 %v2586_v33, %v4058_v61  ;;  %v2591_v19 = vmul.f32 %v2586_v33, %v4070_v11  ;;  %v2592_v27 = vmul.f32 %v2586_v33, %v4081_v29 }
 0x531   : > { %v2593_v43 = vmul.f32 %v2587_v36, %v4060_v58  ;;  %v2594_v39 = vmul.f32 %v2587_v36, %v4064_v23  ;;  %v2595_v17 = vmul.f32 %v2587_v36, %v4072_v40  ;;  %v2596_v28 = vmul.f32 %v2587_v36, %v4076_v10 }
 0x532   : > { %v2605_v52 = vmul.f32 %v2588_v16, %v4265_v13  ;;  %v2606_v61 = vmul.f32 %v2588_v16, %v4263_v41  ;;  %v2607_v11 = vmul.f32 %v2588_v16, %v4267_v2  ;;  %v2608_v29 = vmul.f32 %v2588_v16, %v4266_v7 }
 0x533   : > { %v2597_v58 = vadd.f32 %v2593_v43, %v2589_v26  ;;  %v2598_v30 = vadd.f32 %v2594_v39, %v2590_v4  ;;  %v2599_v23 = vadd.f32 %v2595_v17, %v2591_v19  ;;  %v2600_v55 = vadd.f32 %v2596_v28, %v2592_v27 }
 0x534   : > { %v2613_v40 = vrot.slane %v2605_v52, 2  ;;  %v2614_v42 = vrot.slane %v2606_v61, 2  ;;  %v2615_v10 = vrot.slane %v2607_v11, 2  ;;  %v2616_v44 = vrot.slane %v2608_v29, 2 }
 0x535   : > { %2601 = vst [vmem:[%s359_s21] sm:$0x3f] %v2597_v58  ;;  %2602 = vst [vmem:[%s359_s21 + $0x8] sm:$0x3f] %v2598_v30 }
 0x536   : > { %2603 = vst [vmem:[%s359_s21 + $0x10] sm:$0x3f] %v2599_v23  ;;  %2604 = vst [vmem:[%s359_s21 + $0x18] sm:$0x3f] %v2600_v55  ;;  %v2621_v56 = vadd.f32 %v2613_v40, %v2589_v26  ;;  %v2622_v13 = vadd.f32 %v2614_v42, %v2590_v4  ;;  %v2623_v62 = vadd.f32 %v2615_v10, %v2591_v19 }
 0x537   : > { %v2624_v41 = vadd.f32 %v2616_v44, %v2592_v27 }
 0x538   : > { %2625 = vst [vmem:[%s359_s21] sm:$0xc0] %v2621_v56  ;;  %2626 = vst [vmem:[%s359_s21 + $0x8] sm:$0xc0] %v2622_v13 }
 0x539   : > { %2627 = vst [vmem:[%s359_s21 + $0x10] sm:$0xc0] %v2623_v62  ;;  %2628 = vst [vmem:[%s359_s21 + $0x18] sm:$0xc0] %v2624_v41 }
 0x53a PF: > { %s20_s13 = sadd.s32 1, %s2835_s13  }
 0x53b   : > { %p17_p4 = scmp.ge.s32.totalorder %s20_s13, 4  }
 0x53d   :  { %19 = sbr.rel (!%p17_p4) target bundleno = 1 (0x1), region = 115 }

</bundles_post_ra>
